<compile_context>
chip_gen: v5e
topology: v5e:2x2
jax: 0.10.0
libtpu: 0.0.40
codegen_flags: <defaults>
</compile_context>

<pallas_src>
import jax
import jax.numpy as jnp
from jax.experimental import pallas as pl
from jax.experimental.pallas import tpu as pltpu  # noqa: F401  (not needed at this size)


_BP = 8  # padded batch: one full sublane group


def _full(shape):
    """Whole-array BlockSpec for a grid-less pallas_call."""
    zeros = (0,) * len(shape)
    return pl.BlockSpec(shape, lambda *_: zeros)


def _make_grunet_kernel(T, Bp, H, L):
    """Fused kernel: L GRU layers (wavefront-unrolled) + ReLU + Linear head.

    Refs:
      x_ref  : (T*Bp, H)      bf16  time-major, feature dim zero-padded D -> H
      h0_ref : (L, Bp, H)     f32   initial hidden
      w_ref  : (2L+1, H, 3H)  bf16  [W_ih_0, W_hh_0, ..., W_ih_{L-1}, W_hh_{L-1}, fc_w(pad)]
      b_ref  : (L+1, 2, 3H)   f32   [l,0] = b_ih (+ b_hh for r,z), [l,1,:H] = b_hh_n,
                                    [L,0,:H] = fc bias (zero-padded)
      out_ref: ((L+1)*Bp, H)  f32   rows [l*Bp:(l+1)*Bp] = final h of layer l,
                                    rows [L*Bp:] = fc output (cols >= O are 0)
    Gate ordering follows PyTorch nn.GRU: [r | z | n] chunks of size H.
    """
    H2, H3 = 2 * H, 3 * H

    def kernel(x_ref, h0_ref, w_ref, b_ref, out_ref):
        b_all = b_ref[...]                                    # tiny, load once

        # Hoisted layer-0 input projection: one MXU call for the whole sequence
        # (bias for r,z,n of layer 0 already folded in here).
        gx0 = jnp.dot(x_ref[...], w_ref[0],
                      preferred_element_type=jnp.float32) + b_all[0, 0:1, :]

        # Per-layer biases, broadcast once (hoisted out of the unrolled loops).
        bx = [jnp.broadcast_to(b_all[l, 0:1, :], (Bp, H3)) for l in range(1, L)]
        bhn = [jnp.broadcast_to(b_all[l, 1:2, :H], (Bp, H)) for l in range(L)]

        h = [h0_ref[l] for l in range(L)]                     # (Bp, H) f32 each

        # Wavefront over (t, layer): layer l consumes layer l-1's h_t in the
        # same t-iteration, but its recurrence only depends on its own h_{t-1},
        # so adjacent layers' recurrence matmuls overlap; critical path is
        # T + L - 1 dependent steps instead of T * L.
        for t in range(T):
            for l in range(L):
                if l == 0:
                    # Bp = 8 -> this row slice is sublane-tile aligned (free).
                    gx_t = gx0[t * Bp:(t + 1) * Bp, :]
                else:
                    # Off layer-l's own recurrence chain (depends on h[l-1]_t).
                    gx_t = jnp.dot(h[l - 1].astype(jnp.bfloat16), w_ref[2 * l],
                                   preferred_element_type=jnp.float32) + bx[l - 1]
                gh = jnp.dot(h[l].astype(jnp.bfloat16), w_ref[2 * l + 1],
                             preferred_element_type=jnp.float32)
                # Fused 2H-wide sigmoid for r|z: one EUP vreg push per step.
                rz = jax.nn.sigmoid(gx_t[:, :H2] + gh[:, :H2])
                r = rz[:, :H]
                z = rz[:, H:]
                n = jnp.tanh(gx_t[:, H2:] + r * (gh[:, H2:] + bhn[l]))
                h[l] = n + z * (h[l] - n)          # == (1 - z) * n + z * h

        # Dense output slab: final hidden of every layer ...
        for l in range(L):
            out_ref[l * Bp:(l + 1) * Bp, :] = h[l]
        # ... plus the FC head on ReLU of the top layer's last hidden state
        # (fc_w / fc_b are zero-padded to H columns, so extra cols come out 0).
        y = jnp.dot(jnp.maximum(h[L - 1], 0.0).astype(jnp.bfloat16),
                    w_ref[2 * L][:, :H],
                    preferred_element_type=jnp.float32) + b_all[L, 0:1, :H]
        out_ref[L * Bp:, :] = y

    return kernel


@jax.jit
def grunet_forward(x_btd, h0_lbh, params):
    """x_btd: (B, T, D) batch-first; h0_lbh: (L, B, H).
    Returns (out (B, output_dim), h (L, B, H)) like the PyTorch module."""
    B, T, D = x_btd.shape
    L, _, H = h0_lbh.shape
    O = params["fc"]["w_t"].shape[-1]
    Bp = _BP
    assert B <= Bp and D <= H and O <= H

    # Time-major; batch padded to Bp sublanes and features zero-padded D -> H
    # so layer 0's W_ih fits the packed slab and every access is full-tile.
    x_tbd = jnp.transpose(x_btd, (1, 0, 2)).astype(jnp.float32)
    x_pad = jnp.zeros((T, Bp, H), jnp.float32).at[:, :B, :D].set(x_tbd)
    x2d = x_pad.reshape(T * Bp, H).astype(jnp.bfloat16)

    h0 = jnp.zeros((L, Bp, H), jnp.float32).at[:, :B, :].set(
        h0_lbh.astype(jnp.float32))

    # ---- pack all parameters into two slabs (2 DMAs instead of 4L + 2) ----
    w_slab, b_slab = [], []
    for l in range(L):
        p = params["gru"][l]
        d_in = p["w_ih_t"].shape[0]
        w_ih = jnp.zeros((H, 3 * H), jnp.float32).at[:d_in, :].set(p["w_ih_t"])
        w_slab += [w_ih, p["w_hh_t"]]
        b_ih, b_hh = p["b_ih"], p["b_hh"]
        # Fold b_hh into b_ih for the r,z gates; the n-gate b_hh must stay
        # inside r * (h @ W_hh_n + b_hh_n) to match PyTorch GRU semantics.
        b_x = jnp.concatenate([b_ih[:2 * H] + b_hh[:2 * H], b_ih[2 * H:]])
        b_hn = jnp.zeros((3 * H,), jnp.float32).at[:H].set(b_hh[2 * H:])
        b_slab.append(jnp.stack([b_x, b_hn]))
    fc_w = jnp.zeros((H, 3 * H), jnp.float32).at[:, :O].set(params["fc"]["w_t"])
    fc_b = jnp.zeros((2, 3 * H), jnp.float32).at[0, :O].set(params["fc"]["b"][0])
    w_slab.append(fc_w)
    b_slab.append(fc_b)
    w_slab = jnp.stack(w_slab).astype(jnp.bfloat16)          # (2L+1, H, 3H)
    b_slab = jnp.stack(b_slab)                               # (L+1, 2, 3H) f32

    out_slab = pl.pallas_call(
        _make_grunet_kernel(T, Bp, H, L),
        out_shape=jax.ShapeDtypeStruct(((L + 1) * Bp, H), jnp.float32),
        in_specs=[_full((T * Bp, H)), _full((L, Bp, H)),
                  _full((2 * L + 1, H, 3 * H)), _full((L + 1, 2, 3 * H))],
        out_specs=_full(((L + 1) * Bp, H)),
    )(x2d, h0, w_slab, b_slab)

    h_out = out_slab[:L * Bp].reshape(L, Bp, H)[:, :B, :].astype(x_btd.dtype)
    out = out_slab[L * Bp:L * Bp + B, :O].astype(x_btd.dtype)
    return out, h_out


# ----------------------------------------------------------------------------
# Deterministic parameter init (PyTorch-style U(-1/sqrt(H), 1/sqrt(H))).
# ----------------------------------------------------------------------------
def init_params(key, input_dim, hidden_dim, output_dim, n_layers):
    bound = 1.0 / (hidden_dim ** 0.5)
    params = {"gru": []}
    for layer in range(n_layers):
        d_in = input_dim if layer == 0 else hidden_dim
        key, k1, k2, k3, k4 = jax.random.split(key, 5)
        w_ih = jax.random.uniform(k1, (3 * hidden_dim, d_in),
                                  jnp.float32, -bound, bound)
        w_hh = jax.random.uniform(k2, (3 * hidden_dim, hidden_dim),
                                  jnp.float32, -bound, bound)
        b_ih = jax.random.uniform(k3, (3 * hidden_dim,),
                                  jnp.float32, -bound, bound)
        b_hh = jax.random.uniform(k4, (3 * hidden_dim,),
                                  jnp.float32, -bound, bound)
        params["gru"].append({
            "w_ih_t": w_ih.T,                    # (d_in, 3H)
            "w_hh_t": w_hh.T,                    # (H, 3H)
            "b_ih": b_ih,                        # (3H,)
            "b_hh": b_hh,                        # (3H,)
        })
    key, k1, k2 = jax.random.split(key, 3)
    w_fc = jax.random.uniform(k1, (output_dim, hidden_dim),
                              jnp.float32, -bound, bound)
    b_fc = jax.random.uniform(k2, (output_dim,),
                              jnp.float32, -bound, bound)
    params["fc"] = {"w_t": w_fc.T, "b": b_fc.reshape(1, -1)}
    return params


# ----------------------------------------------------------------------------
# Pure-JAX reference (same PyTorch nn.GRU math, HIGHEST-precision f32 matmuls).
# ----------------------------------------------------------------------------
def grunet_reference(x_btd, h0_lbh, params):
    hp = jax.lax.Precision.HIGHEST
    x = jnp.transpose(x_btd, (1, 0, 2))
    n_layers = h0_lbh.shape[0]
    h_lasts = []
    for layer in range(n_layers):
        p = params["gru"][layer]
        H = p["w_hh_t"].shape[0]

        def step(h, x_t, p=p, H=H):
            gx = jnp.dot(x_t, p["w_ih_t"], precision=hp) + p["b_ih"]
            gh = jnp.dot(h, p["w_hh_t"], precision=hp) + p["b_hh"]
            r = jax.nn.sigmoid(gx[:, :H] + gh[:, :H])
            z = jax.nn.sigmoid(gx[:, H:2 * H] + gh[:, H:2 * H])
            n = jnp.tanh(gx[:, 2 * H:] + r * gh[:, 2 * H:])
            h_new = (1.0 - z) * n + z * h
            return h_new, h_new

        h_last, outs = jax.lax.scan(step, h0_lbh[layer], x)
        x = outs
        h_lasts.append(h_last)
    out = jnp.dot(jnp.maximum(x[-1], 0.0), params["fc"]["w_t"],
                  precision=hp) + params["fc"]["b"]
    return out, jnp.stack(h_lasts, axis=0)


if __name__ == "__main__":
    # Small shapes consistent with the module's forward:
    #   x: (batch=2, seq=8, input_dim=4), h: (n_layers=2, batch=2, hidden=32)
    B, T, D, H, O, L = 2, 8, 4, 32, 3, 2

    key = jax.random.PRNGKey(0)
    kx, kp = jax.random.split(key)
    x = jax.random.normal(kx, (B, T, D), jnp.float32)
    h0 = jnp.zeros((L, B, H), jnp.float32)       # == GRUNet.init_hidden
    params = init_params(kp, D, H, O, L)

    out, h_out = grunet_forward(x, h0, params)
    out = jax.block_until_ready(out)
    h_out = jax.block_until_ready(h_out)

    # bf16 matmul operands (f32 accumulation / gate math) -> relaxed tolerance
    # vs. the f32 HIGHEST-precision reference.
    ref_out, ref_h = grunet_reference(x, h0, params)
    assert out.shape == (B, O) and h_out.shape == (L, B, H)
    assert jnp.allclose(out, ref_out, atol=3e-2, rtol=3e-2)
    assert jnp.allclose(h_out, ref_h, atol=3e-2, rtol=3e-2)

    print("KERNEL_OK")
</pallas_src>

<mosaic_0001>
module attributes {stable_mosaic.version = 11 : i64} {
  func.func @kernel(%arg0: memref<64x32xbf16, #tpu.memory_space<vmem>>, %arg1: memref<2x8x32xf32, #tpu.memory_space<vmem>>, %arg2: memref<5x32x96xbf16, #tpu.memory_space<vmem>>, %arg3: memref<3x2x96xf32, #tpu.memory_space<vmem>>, %arg4: memref<24x32xf32, #tpu.memory_space<vmem>>) attributes {dimension_semantics = [], scalar_prefetch = 0 : i64, scratch_operands = 0 : i64, tpu.core_type = #tpu.core_type<tc>} {
    %c0 = arith.constant 0 : index
    %c0_0 = arith.constant 0 : index
    %c0_1 = arith.constant 0 : index
    %0 = vector.load %arg3[%c0, %c0_0, %c0_1] : memref<3x2x96xf32, #tpu.memory_space<vmem>>, vector<3x2x96xf32>
    %c0_2 = arith.constant 0 : index
    %c0_3 = arith.constant 0 : index
    %1 = vector.load %arg0[%c0_2, %c0_3] : memref<64x32xbf16, #tpu.memory_space<vmem>>, vector<64x32xbf16>
    %c0_4 = arith.constant 0 : index
    %c0_5 = arith.constant 0 : index
    %c0_6 = arith.constant 0 : index
    %2 = vector.load %arg2[%c0_4, %c0_5, %c0_6] : memref<5x32x96xbf16, #tpu.memory_space<vmem>>, vector<1x32x96xbf16>
    %3 = vector.shape_cast %2 : vector<1x32x96xbf16> to vector<32x96xbf16>
    %cst = arith.constant dense<0.000000e+00> : vector<64x96xf32>
    %4 = tpu.matmul %1, %3, %cst {dimension_numbers = #tpu.dot_dimension_numbers<[1], [0], [0], [1], [0, 0, 1, 1], [], []>} : vector<64x32xbf16>, vector<32x96xbf16>, vector<64x96xf32> -> vector<64x96xf32>
    %5 = vector.extract_strided_slice %0 {offsets = [0, 0, 0], sizes = [1, 1, 96], strides = [1, 1, 1]} : vector<3x2x96xf32> to vector<1x1x96xf32>
    %6 = vector.shape_cast %5 : vector<1x1x96xf32> to vector<1x96xf32>
    %7 = vector.broadcast %6 : vector<1x96xf32> to vector<64x96xf32>
    %8 = arith.addf %4, %7 : vector<64x96xf32>
    %9 = vector.extract_strided_slice %0 {offsets = [1, 0, 0], sizes = [1, 1, 96], strides = [1, 1, 1]} : vector<3x2x96xf32> to vector<1x1x96xf32>
    %10 = vector.shape_cast %9 : vector<1x1x96xf32> to vector<1x96xf32>
    %11 = vector.shape_cast %10 : vector<1x96xf32> to vector<1x96xf32>
    %12 = vector.broadcast %11 : vector<1x96xf32> to vector<8x96xf32>
    %13 = vector.extract_strided_slice %0 {offsets = [0, 1, 0], sizes = [1, 1, 32], strides = [1, 1, 1]} : vector<3x2x96xf32> to vector<1x1x32xf32>
    %14 = vector.shape_cast %13 : vector<1x1x32xf32> to vector<1x32xf32>
    %15 = vector.shape_cast %14 : vector<1x32xf32> to vector<1x32xf32>
    %16 = vector.broadcast %15 : vector<1x32xf32> to vector<8x32xf32>
    %17 = vector.extract_strided_slice %0 {offsets = [1, 1, 0], sizes = [1, 1, 32], strides = [1, 1, 1]} : vector<3x2x96xf32> to vector<1x1x32xf32>
    %18 = vector.shape_cast %17 : vector<1x1x32xf32> to vector<1x32xf32>
    %19 = vector.shape_cast %18 : vector<1x32xf32> to vector<1x32xf32>
    %20 = vector.broadcast %19 : vector<1x32xf32> to vector<8x32xf32>
    %c0_7 = arith.constant 0 : index
    %c0_8 = arith.constant 0 : index
    %c0_9 = arith.constant 0 : index
    %21 = vector.load %arg1[%c0_7, %c0_8, %c0_9] : memref<2x8x32xf32, #tpu.memory_space<vmem>>, vector<1x8x32xf32>
    %22 = vector.shape_cast %21 : vector<1x8x32xf32> to vector<8x32xf32>
    %c1 = arith.constant 1 : index
    %c0_10 = arith.constant 0 : index
    %c0_11 = arith.constant 0 : index
    %23 = vector.load %arg1[%c1, %c0_10, %c0_11] : memref<2x8x32xf32, #tpu.memory_space<vmem>>, vector<1x8x32xf32>
    %24 = vector.shape_cast %23 : vector<1x8x32xf32> to vector<8x32xf32>
    %25 = vector.extract_strided_slice %8 {offsets = [0, 0], sizes = [8, 96], strides = [1, 1]} : vector<64x96xf32> to vector<8x96xf32>
    %26 = arith.truncf %22 : vector<8x32xf32> to vector<8x32xbf16>
    %c1_12 = arith.constant 1 : index
    %c0_13 = arith.constant 0 : index
    %c0_14 = arith.constant 0 : index
    %27 = vector.load %arg2[%c1_12, %c0_13, %c0_14] : memref<5x32x96xbf16, #tpu.memory_space<vmem>>, vector<1x32x96xbf16>
    %28 = vector.shape_cast %27 : vector<1x32x96xbf16> to vector<32x96xbf16>
    %cst_15 = arith.constant dense<0.000000e+00> : vector<8x96xf32>
    %29 = tpu.matmul %26, %28, %cst_15 {dimension_numbers = #tpu.dot_dimension_numbers<[1], [0], [0], [1], [0, 0, 1, 1], [], []>} : vector<8x32xbf16>, vector<32x96xbf16>, vector<8x96xf32> -> vector<8x96xf32>
    %30 = vector.extract_strided_slice %25 {offsets = [0, 0], sizes = [8, 64], strides = [1, 1]} : vector<8x96xf32> to vector<8x64xf32>
    %31 = vector.extract_strided_slice %29 {offsets = [0, 0], sizes = [8, 64], strides = [1, 1]} : vector<8x96xf32> to vector<8x64xf32>
    %32 = arith.addf %30, %31 : vector<8x64xf32>
    %33 = arith.negf %32 : vector<8x64xf32>
    %34 = math.exp %33 : vector<8x64xf32>
    %cst_16 = arith.constant 1.000000e+00 : f32
    %35 = vector.broadcast %cst_16 : f32 to vector<8x64xf32>
    %36 = arith.addf %35, %34 : vector<8x64xf32>
    %37 = arith.divf %35, %36 : vector<8x64xf32>
    %38 = vector.extract_strided_slice %37 {offsets = [0, 0], sizes = [8, 32], strides = [1, 1]} : vector<8x64xf32> to vector<8x32xf32>
    %39 = vector.extract_strided_slice %37 {offsets = [0, 32], sizes = [8, 32], strides = [1, 1]} : vector<8x64xf32> to vector<8x32xf32>
    %40 = vector.extract_strided_slice %25 {offsets = [0, 64], sizes = [8, 32], strides = [1, 1]} : vector<8x96xf32> to vector<8x32xf32>
    %41 = vector.extract_strided_slice %29 {offsets = [0, 64], sizes = [8, 32], strides = [1, 1]} : vector<8x96xf32> to vector<8x32xf32>
    %42 = arith.addf %41, %16 : vector<8x32xf32>
    %43 = arith.mulf %38, %42 : vector<8x32xf32>
    %44 = arith.addf %40, %43 : vector<8x32xf32>
    %45 = math.tanh %44 : vector<8x32xf32>
    %46 = arith.subf %22, %45 : vector<8x32xf32>
    %47 = arith.mulf %39, %46 : vector<8x32xf32>
    %48 = arith.addf %45, %47 : vector<8x32xf32>
    %49 = arith.truncf %48 : vector<8x32xf32> to vector<8x32xbf16>
    %c2 = arith.constant 2 : index
    %c0_17 = arith.constant 0 : index
    %c0_18 = arith.constant 0 : index
    %50 = vector.load %arg2[%c2, %c0_17, %c0_18] : memref<5x32x96xbf16, #tpu.memory_space<vmem>>, vector<1x32x96xbf16>
    %51 = vector.shape_cast %50 : vector<1x32x96xbf16> to vector<32x96xbf16>
    %cst_19 = arith.constant dense<0.000000e+00> : vector<8x96xf32>
    %52 = tpu.matmul %49, %51, %cst_19 {dimension_numbers = #tpu.dot_dimension_numbers<[1], [0], [0], [1], [0, 0, 1, 1], [], []>} : vector<8x32xbf16>, vector<32x96xbf16>, vector<8x96xf32> -> vector<8x96xf32>
    %53 = arith.addf %52, %12 : vector<8x96xf32>
    %54 = arith.truncf %24 : vector<8x32xf32> to vector<8x32xbf16>
    %c3 = arith.constant 3 : index
    %c0_20 = arith.constant 0 : index
    %c0_21 = arith.constant 0 : index
    %55 = vector.load %arg2[%c3, %c0_20, %c0_21] : memref<5x32x96xbf16, #tpu.memory_space<vmem>>, vector<1x32x96xbf16>
    %56 = vector.shape_cast %55 : vector<1x32x96xbf16> to vector<32x96xbf16>
    %cst_22 = arith.constant dense<0.000000e+00> : vector<8x96xf32>
    %57 = tpu.matmul %54, %56, %cst_22 {dimension_numbers = #tpu.dot_dimension_numbers<[1], [0], [0], [1], [0, 0, 1, 1], [], []>} : vector<8x32xbf16>, vector<32x96xbf16>, vector<8x96xf32> -> vector<8x96xf32>
    %58 = vector.extract_strided_slice %53 {offsets = [0, 0], sizes = [8, 64], strides = [1, 1]} : vector<8x96xf32> to vector<8x64xf32>
    %59 = vector.extract_strided_slice %57 {offsets = [0, 0], sizes = [8, 64], strides = [1, 1]} : vector<8x96xf32> to vector<8x64xf32>
    %60 = arith.addf %58, %59 : vector<8x64xf32>
    %61 = arith.negf %60 : vector<8x64xf32>
    %62 = math.exp %61 : vector<8x64xf32>
    %cst_23 = arith.constant 1.000000e+00 : f32
    %63 = vector.broadcast %cst_23 : f32 to vector<8x64xf32>
    %64 = arith.addf %63, %62 : vector<8x64xf32>
    %65 = arith.divf %63, %64 : vector<8x64xf32>
    %66 = vector.extract_strided_slice %65 {offsets = [0, 0], sizes = [8, 32], strides = [1, 1]} : vector<8x64xf32> to vector<8x32xf32>
    %67 = vector.extract_strided_slice %65 {offsets = [0, 32], sizes = [8, 32], strides = [1, 1]} : vector<8x64xf32> to vector<8x32xf32>
    %68 = vector.extract_strided_slice %53 {offsets = [0, 64], sizes = [8, 32], strides = [1, 1]} : vector<8x96xf32> to vector<8x32xf32>
    %69 = vector.extract_strided_slice %57 {offsets = [0, 64], sizes = [8, 32], strides = [1, 1]} : vector<8x96xf32> to vector<8x32xf32>
    %70 = arith.addf %69, %20 : vector<8x32xf32>
    %71 = arith.mulf %66, %70 : vector<8x32xf32>
    %72 = arith.addf %68, %71 : vector<8x32xf32>
    %73 = math.tanh %72 : vector<8x32xf32>
    %74 = arith.subf %24, %73 : vector<8x32xf32>
    %75 = arith.mulf %67, %74 : vector<8x32xf32>
    %76 = arith.addf %73, %75 : vector<8x32xf32>
    %77 = vector.extract_strided_slice %8 {offsets = [8, 0], sizes = [8, 96], strides = [1, 1]} : vector<64x96xf32> to vector<8x96xf32>
    %78 = arith.truncf %48 : vector<8x32xf32> to vector<8x32xbf16>
    %c1_24 = arith.constant 1 : index
    %c0_25 = arith.constant 0 : index
    %c0_26 = arith.constant 0 : index
    %79 = vector.load %arg2[%c1_24, %c0_25, %c0_26] : memref<5x32x96xbf16, #tpu.memory_space<vmem>>, vector<1x32x96xbf16>
    %80 = vector.shape_cast %79 : vector<1x32x96xbf16> to vector<32x96xbf16>
    %cst_27 = arith.constant dense<0.000000e+00> : vector<8x96xf32>
    %81 = tpu.matmul %78, %80, %cst_27 {dimension_numbers = #tpu.dot_dimension_numbers<[1], [0], [0], [1], [0, 0, 1, 1], [], []>} : vector<8x32xbf16>, vector<32x96xbf16>, vector<8x96xf32> -> vector<8x96xf32>
    %82 = vector.extract_strided_slice %77 {offsets = [0, 0], sizes = [8, 64], strides = [1, 1]} : vector<8x96xf32> to vector<8x64xf32>
    %83 = vector.extract_strided_slice %81 {offsets = [0, 0], sizes = [8, 64], strides = [1, 1]} : vector<8x96xf32> to vector<8x64xf32>
    %84 = arith.addf %82, %83 : vector<8x64xf32>
    %85 = arith.negf %84 : vector<8x64xf32>
    %86 = math.exp %85 : vector<8x64xf32>
    %cst_28 = arith.constant 1.000000e+00 : f32
    %87 = vector.broadcast %cst_28 : f32 to vector<8x64xf32>
    %88 = arith.addf %87, %86 : vector<8x64xf32>
    %89 = arith.divf %87, %88 : vector<8x64xf32>
    %90 = vector.extract_strided_slice %89 {offsets = [0, 0], sizes = [8, 32], strides = [1, 1]} : vector<8x64xf32> to vector<8x32xf32>
    %91 = vector.extract_strided_slice %89 {offsets = [0, 32], sizes = [8, 32], strides = [1, 1]} : vector<8x64xf32> to vector<8x32xf32>
    %92 = vector.extract_strided_slice %77 {offsets = [0, 64], sizes = [8, 32], strides = [1, 1]} : vector<8x96xf32> to vector<8x32xf32>
    %93 = vector.extract_strided_slice %81 {offsets = [0, 64], sizes = [8, 32], strides = [1, 1]} : vector<8x96xf32> to vector<8x32xf32>
    %94 = arith.addf %93, %16 : vector<8x32xf32>
    %95 = arith.mulf %90, %94 : vector<8x32xf32>
    %96 = arith.addf %92, %95 : vector<8x32xf32>
    %97 = math.tanh %96 : vector<8x32xf32>
    %98 = arith.subf %48, %97 : vector<8x32xf32>
    %99 = arith.mulf %91, %98 : vector<8x32xf32>
    %100 = arith.addf %97, %99 : vector<8x32xf32>
    %101 = arith.truncf %100 : vector<8x32xf32> to vector<8x32xbf16>
    %c2_29 = arith.constant 2 : index
    %c0_30 = arith.constant 0 : index
    %c0_31 = arith.constant 0 : index
    %102 = vector.load %arg2[%c2_29, %c0_30, %c0_31] : memref<5x32x96xbf16, #tpu.memory_space<vmem>>, vector<1x32x96xbf16>
    %103 = vector.shape_cast %102 : vector<1x32x96xbf16> to vector<32x96xbf16>
    %cst_32 = arith.constant dense<0.000000e+00> : vector<8x96xf32>
    %104 = tpu.matmul %101, %103, %cst_32 {dimension_numbers = #tpu.dot_dimension_numbers<[1], [0], [0], [1], [0, 0, 1, 1], [], []>} : vector<8x32xbf16>, vector<32x96xbf16>, vector<8x96xf32> -> vector<8x96xf32>
    %105 = arith.addf %104, %12 : vector<8x96xf32>
    %106 = arith.truncf %76 : vector<8x32xf32> to vector<8x32xbf16>
    %c3_33 = arith.constant 3 : index
    %c0_34 = arith.constant 0 : index
    %c0_35 = arith.constant 0 : index
    %107 = vector.load %arg2[%c3_33, %c0_34, %c0_35] : memref<5x32x96xbf16, #tpu.memory_space<vmem>>, vector<1x32x96xbf16>
    %108 = vector.shape_cast %107 : vector<1x32x96xbf16> to vector<32x96xbf16>
    %cst_36 = arith.constant dense<0.000000e+00> : vector<8x96xf32>
    %109 = tpu.matmul %106, %108, %cst_36 {dimension_numbers = #tpu.dot_dimension_numbers<[1], [0], [0], [1], [0, 0, 1, 1], [], []>} : vector<8x32xbf16>, vector<32x96xbf16>, vector<8x96xf32> -> vector<8x96xf32>
    %110 = vector.extract_strided_slice %105 {offsets = [0, 0], sizes = [8, 64], strides = [1, 1]} : vector<8x96xf32> to vector<8x64xf32>
    %111 = vector.extract_strided_slice %109 {offsets = [0, 0], sizes = [8, 64], strides = [1, 1]} : vector<8x96xf32> to vector<8x64xf32>
    %112 = arith.addf %110, %111 : vector<8x64xf32>
    %113 = arith.negf %112 : vector<8x64xf32>
    %114 = math.exp %113 : vector<8x64xf32>
    %cst_37 = arith.constant 1.000000e+00 : f32
    %115 = vector.broadcast %cst_37 : f32 to vector<8x64xf32>
    %116 = arith.addf %115, %114 : vector<8x64xf32>
    %117 = arith.divf %115, %116 : vector<8x64xf32>
    %118 = vector.extract_strided_slice %117 {offsets = [0, 0], sizes = [8, 32], strides = [1, 1]} : vector<8x64xf32> to vector<8x32xf32>
    %119 = vector.extract_strided_slice %117 {offsets = [0, 32], sizes = [8, 32], strides = [1, 1]} : vector<8x64xf32> to vector<8x32xf32>
    %120 = vector.extract_strided_slice %105 {offsets = [0, 64], sizes = [8, 32], strides = [1, 1]} : vector<8x96xf32> to vector<8x32xf32>
    %121 = vector.extract_strided_slice %109 {offsets = [0, 64], sizes = [8, 32], strides = [1, 1]} : vector<8x96xf32> to vector<8x32xf32>
    %122 = arith.addf %121, %20 : vector<8x32xf32>
    %123 = arith.mulf %118, %122 : vector<8x32xf32>
    %124 = arith.addf %120, %123 : vector<8x32xf32>
    %125 = math.tanh %124 : vector<8x32xf32>
    %126 = arith.subf %76, %125 : vector<8x32xf32>
    %127 = arith.mulf %119, %126 : vector<8x32xf32>
    %128 = arith.addf %125, %127 : vector<8x32xf32>
    %129 = vector.extract_strided_slice %8 {offsets = [16, 0], sizes = [8, 96], strides = [1, 1]} : vector<64x96xf32> to vector<8x96xf32>
    %130 = arith.truncf %100 : vector<8x32xf32> to vector<8x32xbf16>
    %c1_38 = arith.constant 1 : index
    %c0_39 = arith.constant 0 : index
    %c0_40 = arith.constant 0 : index
    %131 = vector.load %arg2[%c1_38, %c0_39, %c0_40] : memref<5x32x96xbf16, #tpu.memory_space<vmem>>, vector<1x32x96xbf16>
    %132 = vector.shape_cast %131 : vector<1x32x96xbf16> to vector<32x96xbf16>
    %cst_41 = arith.constant dense<0.000000e+00> : vector<8x96xf32>
    %133 = tpu.matmul %130, %132, %cst_41 {dimension_numbers = #tpu.dot_dimension_numbers<[1], [0], [0], [1], [0, 0, 1, 1], [], []>} : vector<8x32xbf16>, vector<32x96xbf16>, vector<8x96xf32> -> vector<8x96xf32>
    %134 = vector.extract_strided_slice %129 {offsets = [0, 0], sizes = [8, 64], strides = [1, 1]} : vector<8x96xf32> to vector<8x64xf32>
    %135 = vector.extract_strided_slice %133 {offsets = [0, 0], sizes = [8, 64], strides = [1, 1]} : vector<8x96xf32> to vector<8x64xf32>
    %136 = arith.addf %134, %135 : vector<8x64xf32>
    %137 = arith.negf %136 : vector<8x64xf32>
    %138 = math.exp %137 : vector<8x64xf32>
    %cst_42 = arith.constant 1.000000e+00 : f32
    %139 = vector.broadcast %cst_42 : f32 to vector<8x64xf32>
    %140 = arith.addf %139, %138 : vector<8x64xf32>
    %141 = arith.divf %139, %140 : vector<8x64xf32>
    %142 = vector.extract_strided_slice %141 {offsets = [0, 0], sizes = [8, 32], strides = [1, 1]} : vector<8x64xf32> to vector<8x32xf32>
    %143 = vector.extract_strided_slice %141 {offsets = [0, 32], sizes = [8, 32], strides = [1, 1]} : vector<8x64xf32> to vector<8x32xf32>
    %144 = vector.extract_strided_slice %129 {offsets = [0, 64], sizes = [8, 32], strides = [1, 1]} : vector<8x96xf32> to vector<8x32xf32>
    %145 = vector.extract_strided_slice %133 {offsets = [0, 64], sizes = [8, 32], strides = [1, 1]} : vector<8x96xf32> to vector<8x32xf32>
    %146 = arith.addf %145, %16 : vector<8x32xf32>
    %147 = arith.mulf %142, %146 : vector<8x32xf32>
    %148 = arith.addf %144, %147 : vector<8x32xf32>
    %149 = math.tanh %148 : vector<8x32xf32>
    %150 = arith.subf %100, %149 : vector<8x32xf32>
    %151 = arith.mulf %143, %150 : vector<8x32xf32>
    %152 = arith.addf %149, %151 : vector<8x32xf32>
    %153 = arith.truncf %152 : vector<8x32xf32> to vector<8x32xbf16>
    %c2_43 = arith.constant 2 : index
    %c0_44 = arith.constant 0 : index
    %c0_45 = arith.constant 0 : index
    %154 = vector.load %arg2[%c2_43, %c0_44, %c0_45] : memref<5x32x96xbf16, #tpu.memory_space<vmem>>, vector<1x32x96xbf16>
    %155 = vector.shape_cast %154 : vector<1x32x96xbf16> to vector<32x96xbf16>
    %cst_46 = arith.constant dense<0.000000e+00> : vector<8x96xf32>
    %156 = tpu.matmul %153, %155, %cst_46 {dimension_numbers = #tpu.dot_dimension_numbers<[1], [0], [0], [1], [0, 0, 1, 1], [], []>} : vector<8x32xbf16>, vector<32x96xbf16>, vector<8x96xf32> -> vector<8x96xf32>
    %157 = arith.addf %156, %12 : vector<8x96xf32>
    %158 = arith.truncf %128 : vector<8x32xf32> to vector<8x32xbf16>
    %c3_47 = arith.constant 3 : index
    %c0_48 = arith.constant 0 : index
    %c0_49 = arith.constant 0 : index
    %159 = vector.load %arg2[%c3_47, %c0_48, %c0_49] : memref<5x32x96xbf16, #tpu.memory_space<vmem>>, vector<1x32x96xbf16>
    %160 = vector.shape_cast %159 : vector<1x32x96xbf16> to vector<32x96xbf16>
    %cst_50 = arith.constant dense<0.000000e+00> : vector<8x96xf32>
    %161 = tpu.matmul %158, %160, %cst_50 {dimension_numbers = #tpu.dot_dimension_numbers<[1], [0], [0], [1], [0, 0, 1, 1], [], []>} : vector<8x32xbf16>, vector<32x96xbf16>, vector<8x96xf32> -> vector<8x96xf32>
    %162 = vector.extract_strided_slice %157 {offsets = [0, 0], sizes = [8, 64], strides = [1, 1]} : vector<8x96xf32> to vector<8x64xf32>
    %163 = vector.extract_strided_slice %161 {offsets = [0, 0], sizes = [8, 64], strides = [1, 1]} : vector<8x96xf32> to vector<8x64xf32>
    %164 = arith.addf %162, %163 : vector<8x64xf32>
    %165 = arith.negf %164 : vector<8x64xf32>
    %166 = math.exp %165 : vector<8x64xf32>
    %cst_51 = arith.constant 1.000000e+00 : f32
    %167 = vector.broadcast %cst_51 : f32 to vector<8x64xf32>
    %168 = arith.addf %167, %166 : vector<8x64xf32>
    %169 = arith.divf %167, %168 : vector<8x64xf32>
    %170 = vector.extract_strided_slice %169 {offsets = [0, 0], sizes = [8, 32], strides = [1, 1]} : vector<8x64xf32> to vector<8x32xf32>
    %171 = vector.extract_strided_slice %169 {offsets = [0, 32], sizes = [8, 32], strides = [1, 1]} : vector<8x64xf32> to vector<8x32xf32>
    %172 = vector.extract_strided_slice %157 {offsets = [0, 64], sizes = [8, 32], strides = [1, 1]} : vector<8x96xf32> to vector<8x32xf32>
    %173 = vector.extract_strided_slice %161 {offsets = [0, 64], sizes = [8, 32], strides = [1, 1]} : vector<8x96xf32> to vector<8x32xf32>
    %174 = arith.addf %173, %20 : vector<8x32xf32>
    %175 = arith.mulf %170, %174 : vector<8x32xf32>
    %176 = arith.addf %172, %175 : vector<8x32xf32>
    %177 = math.tanh %176 : vector<8x32xf32>
    %178 = arith.subf %128, %177 : vector<8x32xf32>
    %179 = arith.mulf %171, %178 : vector<8x32xf32>
    %180 = arith.addf %177, %179 : vector<8x32xf32>
    %181 = vector.extract_strided_slice %8 {offsets = [24, 0], sizes = [8, 96], strides = [1, 1]} : vector<64x96xf32> to vector<8x96xf32>
    %182 = arith.truncf %152 : vector<8x32xf32> to vector<8x32xbf16>
    %c1_52 = arith.constant 1 : index
    %c0_53 = arith.constant 0 : index
    %c0_54 = arith.constant 0 : index
    %183 = vector.load %arg2[%c1_52, %c0_53, %c0_54] : memref<5x32x96xbf16, #tpu.memory_space<vmem>>, vector<1x32x96xbf16>
    %184 = vector.shape_cast %183 : vector<1x32x96xbf16> to vector<32x96xbf16>
    %cst_55 = arith.constant dense<0.000000e+00> : vector<8x96xf32>
    %185 = tpu.matmul %182, %184, %cst_55 {dimension_numbers = #tpu.dot_dimension_numbers<[1], [0], [0], [1], [0, 0, 1, 1], [], []>} : vector<8x32xbf16>, vector<32x96xbf16>, vector<8x96xf32> -> vector<8x96xf32>
    %186 = vector.extract_strided_slice %181 {offsets = [0, 0], sizes = [8, 64], strides = [1, 1]} : vector<8x96xf32> to vector<8x64xf32>
    %187 = vector.extract_strided_slice %185 {offsets = [0, 0], sizes = [8, 64], strides = [1, 1]} : vector<8x96xf32> to vector<8x64xf32>
    %188 = arith.addf %186, %187 : vector<8x64xf32>
    %189 = arith.negf %188 : vector<8x64xf32>
    %190 = math.exp %189 : vector<8x64xf32>
    %cst_56 = arith.constant 1.000000e+00 : f32
    %191 = vector.broadcast %cst_56 : f32 to vector<8x64xf32>
    %192 = arith.addf %191, %190 : vector<8x64xf32>
    %193 = arith.divf %191, %192 : vector<8x64xf32>
    %194 = vector.extract_strided_slice %193 {offsets = [0, 0], sizes = [8, 32], strides = [1, 1]} : vector<8x64xf32> to vector<8x32xf32>
    %195 = vector.extract_strided_slice %193 {offsets = [0, 32], sizes = [8, 32], strides = [1, 1]} : vector<8x64xf32> to vector<8x32xf32>
    %196 = vector.extract_strided_slice %181 {offsets = [0, 64], sizes = [8, 32], strides = [1, 1]} : vector<8x96xf32> to vector<8x32xf32>
    %197 = vector.extract_strided_slice %185 {offsets = [0, 64], sizes = [8, 32], strides = [1, 1]} : vector<8x96xf32> to vector<8x32xf32>
    %198 = arith.addf %197, %16 : vector<8x32xf32>
    %199 = arith.mulf %194, %198 : vector<8x32xf32>
    %200 = arith.addf %196, %199 : vector<8x32xf32>
    %201 = math.tanh %200 : vector<8x32xf32>
    %202 = arith.subf %152, %201 : vector<8x32xf32>
    %203 = arith.mulf %195, %202 : vector<8x32xf32>
    %204 = arith.addf %201, %203 : vector<8x32xf32>
    %205 = arith.truncf %204 : vector<8x32xf32> to vector<8x32xbf16>
    %c2_57 = arith.constant 2 : index
    %c0_58 = arith.constant 0 : index
    %c0_59 = arith.constant 0 : index
    %206 = vector.load %arg2[%c2_57, %c0_58, %c0_59] : memref<5x32x96xbf16, #tpu.memory_space<vmem>>, vector<1x32x96xbf16>
    %207 = vector.shape_cast %206 : vector<1x32x96xbf16> to vector<32x96xbf16>
    %cst_60 = arith.constant dense<0.000000e+00> : vector<8x96xf32>
    %208 = tpu.matmul %205, %207, %cst_60 {dimension_numbers = #tpu.dot_dimension_numbers<[1], [0], [0], [1], [0, 0, 1, 1], [], []>} : vector<8x32xbf16>, vector<32x96xbf16>, vector<8x96xf32> -> vector<8x96xf32>
    %209 = arith.addf %208, %12 : vector<8x96xf32>
    %210 = arith.truncf %180 : vector<8x32xf32> to vector<8x32xbf16>
    %c3_61 = arith.constant 3 : index
    %c0_62 = arith.constant 0 : index
    %c0_63 = arith.constant 0 : index
    %211 = vector.load %arg2[%c3_61, %c0_62, %c0_63] : memref<5x32x96xbf16, #tpu.memory_space<vmem>>, vector<1x32x96xbf16>
    %212 = vector.shape_cast %211 : vector<1x32x96xbf16> to vector<32x96xbf16>
    %cst_64 = arith.constant dense<0.000000e+00> : vector<8x96xf32>
    %213 = tpu.matmul %210, %212, %cst_64 {dimension_numbers = #tpu.dot_dimension_numbers<[1], [0], [0], [1], [0, 0, 1, 1], [], []>} : vector<8x32xbf16>, vector<32x96xbf16>, vector<8x96xf32> -> vector<8x96xf32>
    %214 = vector.extract_strided_slice %209 {offsets = [0, 0], sizes = [8, 64], strides = [1, 1]} : vector<8x96xf32> to vector<8x64xf32>
    %215 = vector.extract_strided_slice %213 {offsets = [0, 0], sizes = [8, 64], strides = [1, 1]} : vector<8x96xf32> to vector<8x64xf32>
    %216 = arith.addf %214, %215 : vector<8x64xf32>
    %217 = arith.negf %216 : vector<8x64xf32>
    %218 = math.exp %217 : vector<8x64xf32>
    %cst_65 = arith.constant 1.000000e+00 : f32
    %219 = vector.broadcast %cst_65 : f32 to vector<8x64xf32>
    %220 = arith.addf %219, %218 : vector<8x64xf32>
    %221 = arith.divf %219, %220 : vector<8x64xf32>
    %222 = vector.extract_strided_slice %221 {offsets = [0, 0], sizes = [8, 32], strides = [1, 1]} : vector<8x64xf32> to vector<8x32xf32>
    %223 = vector.extract_strided_slice %221 {offsets = [0, 32], sizes = [8, 32], strides = [1, 1]} : vector<8x64xf32> to vector<8x32xf32>
    %224 = vector.extract_strided_slice %209 {offsets = [0, 64], sizes = [8, 32], strides = [1, 1]} : vector<8x96xf32> to vector<8x32xf32>
    %225 = vector.extract_strided_slice %213 {offsets = [0, 64], sizes = [8, 32], strides = [1, 1]} : vector<8x96xf32> to vector<8x32xf32>
    %226 = arith.addf %225, %20 : vector<8x32xf32>
    %227 = arith.mulf %222, %226 : vector<8x32xf32>
    %228 = arith.addf %224, %227 : vector<8x32xf32>
    %229 = math.tanh %228 : vector<8x32xf32>
    %230 = arith.subf %180, %229 : vector<8x32xf32>
    %231 = arith.mulf %223, %230 : vector<8x32xf32>
    %232 = arith.addf %229, %231 : vector<8x32xf32>
    %233 = vector.extract_strided_slice %8 {offsets = [32, 0], sizes = [8, 96], strides = [1, 1]} : vector<64x96xf32> to vector<8x96xf32>
    %234 = arith.truncf %204 : vector<8x32xf32> to vector<8x32xbf16>
    %c1_66 = arith.constant 1 : index
    %c0_67 = arith.constant 0 : index
    %c0_68 = arith.constant 0 : index
    %235 = vector.load %arg2[%c1_66, %c0_67, %c0_68] : memref<5x32x96xbf16, #tpu.memory_space<vmem>>, vector<1x32x96xbf16>
    %236 = vector.shape_cast %235 : vector<1x32x96xbf16> to vector<32x96xbf16>
    %cst_69 = arith.constant dense<0.000000e+00> : vector<8x96xf32>
    %237 = tpu.matmul %234, %236, %cst_69 {dimension_numbers = #tpu.dot_dimension_numbers<[1], [0], [0], [1], [0, 0, 1, 1], [], []>} : vector<8x32xbf16>, vector<32x96xbf16>, vector<8x96xf32> -> vector<8x96xf32>
    %238 = vector.extract_strided_slice %233 {offsets = [0, 0], sizes = [8, 64], strides = [1, 1]} : vector<8x96xf32> to vector<8x64xf32>
    %239 = vector.extract_strided_slice %237 {offsets = [0, 0], sizes = [8, 64], strides = [1, 1]} : vector<8x96xf32> to vector<8x64xf32>
    %240 = arith.addf %238, %239 : vector<8x64xf32>
    %241 = arith.negf %240 : vector<8x64xf32>
    %242 = math.exp %241 : vector<8x64xf32>
    %cst_70 = arith.constant 1.000000e+00 : f32
    %243 = vector.broadcast %cst_70 : f32 to vector<8x64xf32>
    %244 = arith.addf %243, %242 : vector<8x64xf32>
    %245 = arith.divf %243, %244 : vector<8x64xf32>
    %246 = vector.extract_strided_slice %245 {offsets = [0, 0], sizes = [8, 32], strides = [1, 1]} : vector<8x64xf32> to vector<8x32xf32>
    %247 = vector.extract_strided_slice %245 {offsets = [0, 32], sizes = [8, 32], strides = [1, 1]} : vector<8x64xf32> to vector<8x32xf32>
    %248 = vector.extract_strided_slice %233 {offsets = [0, 64], sizes = [8, 32], strides = [1, 1]} : vector<8x96xf32> to vector<8x32xf32>
    %249 = vector.extract_strided_slice %237 {offsets = [0, 64], sizes = [8, 32], strides = [1, 1]} : vector<8x96xf32> to vector<8x32xf32>
    %250 = arith.addf %249, %16 : vector<8x32xf32>
    %251 = arith.mulf %246, %250 : vector<8x32xf32>
    %252 = arith.addf %248, %251 : vector<8x32xf32>
    %253 = math.tanh %252 : vector<8x32xf32>
    %254 = arith.subf %204, %253 : vector<8x32xf32>
    %255 = arith.mulf %247, %254 : vector<8x32xf32>
    %256 = arith.addf %253, %255 : vector<8x32xf32>
    %257 = arith.truncf %256 : vector<8x32xf32> to vector<8x32xbf16>
    %c2_71 = arith.constant 2 : index
    %c0_72 = arith.constant 0 : index
    %c0_73 = arith.constant 0 : index
    %258 = vector.load %arg2[%c2_71, %c0_72, %c0_73] : memref<5x32x96xbf16, #tpu.memory_space<vmem>>, vector<1x32x96xbf16>
    %259 = vector.shape_cast %258 : vector<1x32x96xbf16> to vector<32x96xbf16>
    %cst_74 = arith.constant dense<0.000000e+00> : vector<8x96xf32>
    %260 = tpu.matmul %257, %259, %cst_74 {dimension_numbers = #tpu.dot_dimension_numbers<[1], [0], [0], [1], [0, 0, 1, 1], [], []>} : vector<8x32xbf16>, vector<32x96xbf16>, vector<8x96xf32> -> vector<8x96xf32>
    %261 = arith.addf %260, %12 : vector<8x96xf32>
    %262 = arith.truncf %232 : vector<8x32xf32> to vector<8x32xbf16>
    %c3_75 = arith.constant 3 : index
    %c0_76 = arith.constant 0 : index
    %c0_77 = arith.constant 0 : index
    %263 = vector.load %arg2[%c3_75, %c0_76, %c0_77] : memref<5x32x96xbf16, #tpu.memory_space<vmem>>, vector<1x32x96xbf16>
    %264 = vector.shape_cast %263 : vector<1x32x96xbf16> to vector<32x96xbf16>
    %cst_78 = arith.constant dense<0.000000e+00> : vector<8x96xf32>
    %265 = tpu.matmul %262, %264, %cst_78 {dimension_numbers = #tpu.dot_dimension_numbers<[1], [0], [0], [1], [0, 0, 1, 1], [], []>} : vector<8x32xbf16>, vector<32x96xbf16>, vector<8x96xf32> -> vector<8x96xf32>
    %266 = vector.extract_strided_slice %261 {offsets = [0, 0], sizes = [8, 64], strides = [1, 1]} : vector<8x96xf32> to vector<8x64xf32>
    %267 = vector.extract_strided_slice %265 {offsets = [0, 0], sizes = [8, 64], strides = [1, 1]} : vector<8x96xf32> to vector<8x64xf32>
    %268 = arith.addf %266, %267 : vector<8x64xf32>
    %269 = arith.negf %268 : vector<8x64xf32>
    %270 = math.exp %269 : vector<8x64xf32>
    %cst_79 = arith.constant 1.000000e+00 : f32
    %271 = vector.broadcast %cst_79 : f32 to vector<8x64xf32>
    %272 = arith.addf %271, %270 : vector<8x64xf32>
    %273 = arith.divf %271, %272 : vector<8x64xf32>
    %274 = vector.extract_strided_slice %273 {offsets = [0, 0], sizes = [8, 32], strides = [1, 1]} : vector<8x64xf32> to vector<8x32xf32>
    %275 = vector.extract_strided_slice %273 {offsets = [0, 32], sizes = [8, 32], strides = [1, 1]} : vector<8x64xf32> to vector<8x32xf32>
    %276 = vector.extract_strided_slice %261 {offsets = [0, 64], sizes = [8, 32], strides = [1, 1]} : vector<8x96xf32> to vector<8x32xf32>
    %277 = vector.extract_strided_slice %265 {offsets = [0, 64], sizes = [8, 32], strides = [1, 1]} : vector<8x96xf32> to vector<8x32xf32>
    %278 = arith.addf %277, %20 : vector<8x32xf32>
    %279 = arith.mulf %274, %278 : vector<8x32xf32>
    %280 = arith.addf %276, %279 : vector<8x32xf32>
    %281 = math.tanh %280 : vector<8x32xf32>
    %282 = arith.subf %232, %281 : vector<8x32xf32>
    %283 = arith.mulf %275, %282 : vector<8x32xf32>
    %284 = arith.addf %281, %283 : vector<8x32xf32>
    %285 = vector.extract_strided_slice %8 {offsets = [40, 0], sizes = [8, 96], strides = [1, 1]} : vector<64x96xf32> to vector<8x96xf32>
    %286 = arith.truncf %256 : vector<8x32xf32> to vector<8x32xbf16>
    %c1_80 = arith.constant 1 : index
    %c0_81 = arith.constant 0 : index
    %c0_82 = arith.constant 0 : index
    %287 = vector.load %arg2[%c1_80, %c0_81, %c0_82] : memref<5x32x96xbf16, #tpu.memory_space<vmem>>, vector<1x32x96xbf16>
    %288 = vector.shape_cast %287 : vector<1x32x96xbf16> to vector<32x96xbf16>
    %cst_83 = arith.constant dense<0.000000e+00> : vector<8x96xf32>
    %289 = tpu.matmul %286, %288, %cst_83 {dimension_numbers = #tpu.dot_dimension_numbers<[1], [0], [0], [1], [0, 0, 1, 1], [], []>} : vector<8x32xbf16>, vector<32x96xbf16>, vector<8x96xf32> -> vector<8x96xf32>
    %290 = vector.extract_strided_slice %285 {offsets = [0, 0], sizes = [8, 64], strides = [1, 1]} : vector<8x96xf32> to vector<8x64xf32>
    %291 = vector.extract_strided_slice %289 {offsets = [0, 0], sizes = [8, 64], strides = [1, 1]} : vector<8x96xf32> to vector<8x64xf32>
    %292 = arith.addf %290, %291 : vector<8x64xf32>
    %293 = arith.negf %292 : vector<8x64xf32>
    %294 = math.exp %293 : vector<8x64xf32>
    %cst_84 = arith.constant 1.000000e+00 : f32
    %295 = vector.broadcast %cst_84 : f32 to vector<8x64xf32>
    %296 = arith.addf %295, %294 : vector<8x64xf32>
    %297 = arith.divf %295, %296 : vector<8x64xf32>
    %298 = vector.extract_strided_slice %297 {offsets = [0, 0], sizes = [8, 32], strides = [1, 1]} : vector<8x64xf32> to vector<8x32xf32>
    %299 = vector.extract_strided_slice %297 {offsets = [0, 32], sizes = [8, 32], strides = [1, 1]} : vector<8x64xf32> to vector<8x32xf32>
    %300 = vector.extract_strided_slice %285 {offsets = [0, 64], sizes = [8, 32], strides = [1, 1]} : vector<8x96xf32> to vector<8x32xf32>
    %301 = vector.extract_strided_slice %289 {offsets = [0, 64], sizes = [8, 32], strides = [1, 1]} : vector<8x96xf32> to vector<8x32xf32>
    %302 = arith.addf %301, %16 : vector<8x32xf32>
    %303 = arith.mulf %298, %302 : vector<8x32xf32>
    %304 = arith.addf %300, %303 : vector<8x32xf32>
    %305 = math.tanh %304 : vector<8x32xf32>
    %306 = arith.subf %256, %305 : vector<8x32xf32>
    %307 = arith.mulf %299, %306 : vector<8x32xf32>
    %308 = arith.addf %305, %307 : vector<8x32xf32>
    %309 = arith.truncf %308 : vector<8x32xf32> to vector<8x32xbf16>
    %c2_85 = arith.constant 2 : index
    %c0_86 = arith.constant 0 : index
    %c0_87 = arith.constant 0 : index
    %310 = vector.load %arg2[%c2_85, %c0_86, %c0_87] : memref<5x32x96xbf16, #tpu.memory_space<vmem>>, vector<1x32x96xbf16>
    %311 = vector.shape_cast %310 : vector<1x32x96xbf16> to vector<32x96xbf16>
    %cst_88 = arith.constant dense<0.000000e+00> : vector<8x96xf32>
    %312 = tpu.matmul %309, %311, %cst_88 {dimension_numbers = #tpu.dot_dimension_numbers<[1], [0], [0], [1], [0, 0, 1, 1], [], []>} : vector<8x32xbf16>, vector<32x96xbf16>, vector<8x96xf32> -> vector<8x96xf32>
    %313 = arith.addf %312, %12 : vector<8x96xf32>
    %314 = arith.truncf %284 : vector<8x32xf32> to vector<8x32xbf16>
    %c3_89 = arith.constant 3 : index
    %c0_90 = arith.constant 0 : index
    %c0_91 = arith.constant 0 : index
    %315 = vector.load %arg2[%c3_89, %c0_90, %c0_91] : memref<5x32x96xbf16, #tpu.memory_space<vmem>>, vector<1x32x96xbf16>
    %316 = vector.shape_cast %315 : vector<1x32x96xbf16> to vector<32x96xbf16>
    %cst_92 = arith.constant dense<0.000000e+00> : vector<8x96xf32>
    %317 = tpu.matmul %314, %316, %cst_92 {dimension_numbers = #tpu.dot_dimension_numbers<[1], [0], [0], [1], [0, 0, 1, 1], [], []>} : vector<8x32xbf16>, vector<32x96xbf16>, vector<8x96xf32> -> vector<8x96xf32>
    %318 = vector.extract_strided_slice %313 {offsets = [0, 0], sizes = [8, 64], strides = [1, 1]} : vector<8x96xf32> to vector<8x64xf32>
    %319 = vector.extract_strided_slice %317 {offsets = [0, 0], sizes = [8, 64], strides = [1, 1]} : vector<8x96xf32> to vector<8x64xf32>
    %320 = arith.addf %318, %319 : vector<8x64xf32>
    %321 = arith.negf %320 : vector<8x64xf32>
    %322 = math.exp %321 : vector<8x64xf32>
    %cst_93 = arith.constant 1.000000e+00 : f32
    %323 = vector.broadcast %cst_93 : f32 to vector<8x64xf32>
    %324 = arith.addf %323, %322 : vector<8x64xf32>
    %325 = arith.divf %323, %324 : vector<8x64xf32>
    %326 = vector.extract_strided_slice %325 {offsets = [0, 0], sizes = [8, 32], strides = [1, 1]} : vector<8x64xf32> to vector<8x32xf32>
    %327 = vector.extract_strided_slice %325 {offsets = [0, 32], sizes = [8, 32], strides = [1, 1]} : vector<8x64xf32> to vector<8x32xf32>
    %328 = vector.extract_strided_slice %313 {offsets = [0, 64], sizes = [8, 32], strides = [1, 1]} : vector<8x96xf32> to vector<8x32xf32>
    %329 = vector.extract_strided_slice %317 {offsets = [0, 64], sizes = [8, 32], strides = [1, 1]} : vector<8x96xf32> to vector<8x32xf32>
    %330 = arith.addf %329, %20 : vector<8x32xf32>
    %331 = arith.mulf %326, %330 : vector<8x32xf32>
    %332 = arith.addf %328, %331 : vector<8x32xf32>
    %333 = math.tanh %332 : vector<8x32xf32>
    %334 = arith.subf %284, %333 : vector<8x32xf32>
    %335 = arith.mulf %327, %334 : vector<8x32xf32>
    %336 = arith.addf %333, %335 : vector<8x32xf32>
    %337 = vector.extract_strided_slice %8 {offsets = [48, 0], sizes = [8, 96], strides = [1, 1]} : vector<64x96xf32> to vector<8x96xf32>
    %338 = arith.truncf %308 : vector<8x32xf32> to vector<8x32xbf16>
    %c1_94 = arith.constant 1 : index
    %c0_95 = arith.constant 0 : index
    %c0_96 = arith.constant 0 : index
    %339 = vector.load %arg2[%c1_94, %c0_95, %c0_96] : memref<5x32x96xbf16, #tpu.memory_space<vmem>>, vector<1x32x96xbf16>
    %340 = vector.shape_cast %339 : vector<1x32x96xbf16> to vector<32x96xbf16>
    %cst_97 = arith.constant dense<0.000000e+00> : vector<8x96xf32>
    %341 = tpu.matmul %338, %340, %cst_97 {dimension_numbers = #tpu.dot_dimension_numbers<[1], [0], [0], [1], [0, 0, 1, 1], [], []>} : vector<8x32xbf16>, vector<32x96xbf16>, vector<8x96xf32> -> vector<8x96xf32>
    %342 = vector.extract_strided_slice %337 {offsets = [0, 0], sizes = [8, 64], strides = [1, 1]} : vector<8x96xf32> to vector<8x64xf32>
    %343 = vector.extract_strided_slice %341 {offsets = [0, 0], sizes = [8, 64], strides = [1, 1]} : vector<8x96xf32> to vector<8x64xf32>
    %344 = arith.addf %342, %343 : vector<8x64xf32>
    %345 = arith.negf %344 : vector<8x64xf32>
    %346 = math.exp %345 : vector<8x64xf32>
    %cst_98 = arith.constant 1.000000e+00 : f32
    %347 = vector.broadcast %cst_98 : f32 to vector<8x64xf32>
    %348 = arith.addf %347, %346 : vector<8x64xf32>
    %349 = arith.divf %347, %348 : vector<8x64xf32>
    %350 = vector.extract_strided_slice %349 {offsets = [0, 0], sizes = [8, 32], strides = [1, 1]} : vector<8x64xf32> to vector<8x32xf32>
    %351 = vector.extract_strided_slice %349 {offsets = [0, 32], sizes = [8, 32], strides = [1, 1]} : vector<8x64xf32> to vector<8x32xf32>
    %352 = vector.extract_strided_slice %337 {offsets = [0, 64], sizes = [8, 32], strides = [1, 1]} : vector<8x96xf32> to vector<8x32xf32>
    %353 = vector.extract_strided_slice %341 {offsets = [0, 64], sizes = [8, 32], strides = [1, 1]} : vector<8x96xf32> to vector<8x32xf32>
    %354 = arith.addf %353, %16 : vector<8x32xf32>
    %355 = arith.mulf %350, %354 : vector<8x32xf32>
    %356 = arith.addf %352, %355 : vector<8x32xf32>
    %357 = math.tanh %356 : vector<8x32xf32>
    %358 = arith.subf %308, %357 : vector<8x32xf32>
    %359 = arith.mulf %351, %358 : vector<8x32xf32>
    %360 = arith.addf %357, %359 : vector<8x32xf32>
    %361 = arith.truncf %360 : vector<8x32xf32> to vector<8x32xbf16>
    %c2_99 = arith.constant 2 : index
    %c0_100 = arith.constant 0 : index
    %c0_101 = arith.constant 0 : index
    %362 = vector.load %arg2[%c2_99, %c0_100, %c0_101] : memref<5x32x96xbf16, #tpu.memory_space<vmem>>, vector<1x32x96xbf16>
    %363 = vector.shape_cast %362 : vector<1x32x96xbf16> to vector<32x96xbf16>
    %cst_102 = arith.constant dense<0.000000e+00> : vector<8x96xf32>
    %364 = tpu.matmul %361, %363, %cst_102 {dimension_numbers = #tpu.dot_dimension_numbers<[1], [0], [0], [1], [0, 0, 1, 1], [], []>} : vector<8x32xbf16>, vector<32x96xbf16>, vector<8x96xf32> -> vector<8x96xf32>
    %365 = arith.addf %364, %12 : vector<8x96xf32>
    %366 = arith.truncf %336 : vector<8x32xf32> to vector<8x32xbf16>
    %c3_103 = arith.constant 3 : index
    %c0_104 = arith.constant 0 : index
    %c0_105 = arith.constant 0 : index
    %367 = vector.load %arg2[%c3_103, %c0_104, %c0_105] : memref<5x32x96xbf16, #tpu.memory_space<vmem>>, vector<1x32x96xbf16>
    %368 = vector.shape_cast %367 : vector<1x32x96xbf16> to vector<32x96xbf16>
    %cst_106 = arith.constant dense<0.000000e+00> : vector<8x96xf32>
    %369 = tpu.matmul %366, %368, %cst_106 {dimension_numbers = #tpu.dot_dimension_numbers<[1], [0], [0], [1], [0, 0, 1, 1], [], []>} : vector<8x32xbf16>, vector<32x96xbf16>, vector<8x96xf32> -> vector<8x96xf32>
    %370 = vector.extract_strided_slice %365 {offsets = [0, 0], sizes = [8, 64], strides = [1, 1]} : vector<8x96xf32> to vector<8x64xf32>
    %371 = vector.extract_strided_slice %369 {offsets = [0, 0], sizes = [8, 64], strides = [1, 1]} : vector<8x96xf32> to vector<8x64xf32>
    %372 = arith.addf %370, %371 : vector<8x64xf32>
    %373 = arith.negf %372 : vector<8x64xf32>
    %374 = math.exp %373 : vector<8x64xf32>
    %cst_107 = arith.constant 1.000000e+00 : f32
    %375 = vector.broadcast %cst_107 : f32 to vector<8x64xf32>
    %376 = arith.addf %375, %374 : vector<8x64xf32>
    %377 = arith.divf %375, %376 : vector<8x64xf32>
    %378 = vector.extract_strided_slice %377 {offsets = [0, 0], sizes = [8, 32], strides = [1, 1]} : vector<8x64xf32> to vector<8x32xf32>
    %379 = vector.extract_strided_slice %377 {offsets = [0, 32], sizes = [8, 32], strides = [1, 1]} : vector<8x64xf32> to vector<8x32xf32>
    %380 = vector.extract_strided_slice %365 {offsets = [0, 64], sizes = [8, 32], strides = [1, 1]} : vector<8x96xf32> to vector<8x32xf32>
    %381 = vector.extract_strided_slice %369 {offsets = [0, 64], sizes = [8, 32], strides = [1, 1]} : vector<8x96xf32> to vector<8x32xf32>
    %382 = arith.addf %381, %20 : vector<8x32xf32>
    %383 = arith.mulf %378, %382 : vector<8x32xf32>
    %384 = arith.addf %380, %383 : vector<8x32xf32>
    %385 = math.tanh %384 : vector<8x32xf32>
    %386 = arith.subf %336, %385 : vector<8x32xf32>
    %387 = arith.mulf %379, %386 : vector<8x32xf32>
    %388 = arith.addf %385, %387 : vector<8x32xf32>
    %389 = vector.extract_strided_slice %8 {offsets = [56, 0], sizes = [8, 96], strides = [1, 1]} : vector<64x96xf32> to vector<8x96xf32>
    %390 = arith.truncf %360 : vector<8x32xf32> to vector<8x32xbf16>
    %c1_108 = arith.constant 1 : index
    %c0_109 = arith.constant 0 : index
    %c0_110 = arith.constant 0 : index
    %391 = vector.load %arg2[%c1_108, %c0_109, %c0_110] : memref<5x32x96xbf16, #tpu.memory_space<vmem>>, vector<1x32x96xbf16>
    %392 = vector.shape_cast %391 : vector<1x32x96xbf16> to vector<32x96xbf16>
    %cst_111 = arith.constant dense<0.000000e+00> : vector<8x96xf32>
    %393 = tpu.matmul %390, %392, %cst_111 {dimension_numbers = #tpu.dot_dimension_numbers<[1], [0], [0], [1], [0, 0, 1, 1], [], []>} : vector<8x32xbf16>, vector<32x96xbf16>, vector<8x96xf32> -> vector<8x96xf32>
    %394 = vector.extract_strided_slice %389 {offsets = [0, 0], sizes = [8, 64], strides = [1, 1]} : vector<8x96xf32> to vector<8x64xf32>
    %395 = vector.extract_strided_slice %393 {offsets = [0, 0], sizes = [8, 64], strides = [1, 1]} : vector<8x96xf32> to vector<8x64xf32>
    %396 = arith.addf %394, %395 : vector<8x64xf32>
    %397 = arith.negf %396 : vector<8x64xf32>
    %398 = math.exp %397 : vector<8x64xf32>
    %cst_112 = arith.constant 1.000000e+00 : f32
    %399 = vector.broadcast %cst_112 : f32 to vector<8x64xf32>
    %400 = arith.addf %399, %398 : vector<8x64xf32>
    %401 = arith.divf %399, %400 : vector<8x64xf32>
    %402 = vector.extract_strided_slice %401 {offsets = [0, 0], sizes = [8, 32], strides = [1, 1]} : vector<8x64xf32> to vector<8x32xf32>
    %403 = vector.extract_strided_slice %401 {offsets = [0, 32], sizes = [8, 32], strides = [1, 1]} : vector<8x64xf32> to vector<8x32xf32>
    %404 = vector.extract_strided_slice %389 {offsets = [0, 64], sizes = [8, 32], strides = [1, 1]} : vector<8x96xf32> to vector<8x32xf32>
    %405 = vector.extract_strided_slice %393 {offsets = [0, 64], sizes = [8, 32], strides = [1, 1]} : vector<8x96xf32> to vector<8x32xf32>
    %406 = arith.addf %405, %16 : vector<8x32xf32>
    %407 = arith.mulf %402, %406 : vector<8x32xf32>
    %408 = arith.addf %404, %407 : vector<8x32xf32>
    %409 = math.tanh %408 : vector<8x32xf32>
    %410 = arith.subf %360, %409 : vector<8x32xf32>
    %411 = arith.mulf %403, %410 : vector<8x32xf32>
    %412 = arith.addf %409, %411 : vector<8x32xf32>
    %413 = arith.truncf %412 : vector<8x32xf32> to vector<8x32xbf16>
    %c2_113 = arith.constant 2 : index
    %c0_114 = arith.constant 0 : index
    %c0_115 = arith.constant 0 : index
    %414 = vector.load %arg2[%c2_113, %c0_114, %c0_115] : memref<5x32x96xbf16, #tpu.memory_space<vmem>>, vector<1x32x96xbf16>
    %415 = vector.shape_cast %414 : vector<1x32x96xbf16> to vector<32x96xbf16>
    %cst_116 = arith.constant dense<0.000000e+00> : vector<8x96xf32>
    %416 = tpu.matmul %413, %415, %cst_116 {dimension_numbers = #tpu.dot_dimension_numbers<[1], [0], [0], [1], [0, 0, 1, 1], [], []>} : vector<8x32xbf16>, vector<32x96xbf16>, vector<8x96xf32> -> vector<8x96xf32>
    %417 = arith.addf %416, %12 : vector<8x96xf32>
    %418 = arith.truncf %388 : vector<8x32xf32> to vector<8x32xbf16>
    %c3_117 = arith.constant 3 : index
    %c0_118 = arith.constant 0 : index
    %c0_119 = arith.constant 0 : index
    %419 = vector.load %arg2[%c3_117, %c0_118, %c0_119] : memref<5x32x96xbf16, #tpu.memory_space<vmem>>, vector<1x32x96xbf16>
    %420 = vector.shape_cast %419 : vector<1x32x96xbf16> to vector<32x96xbf16>
    %cst_120 = arith.constant dense<0.000000e+00> : vector<8x96xf32>
    %421 = tpu.matmul %418, %420, %cst_120 {dimension_numbers = #tpu.dot_dimension_numbers<[1], [0], [0], [1], [0, 0, 1, 1], [], []>} : vector<8x32xbf16>, vector<32x96xbf16>, vector<8x96xf32> -> vector<8x96xf32>
    %422 = vector.extract_strided_slice %417 {offsets = [0, 0], sizes = [8, 64], strides = [1, 1]} : vector<8x96xf32> to vector<8x64xf32>
    %423 = vector.extract_strided_slice %421 {offsets = [0, 0], sizes = [8, 64], strides = [1, 1]} : vector<8x96xf32> to vector<8x64xf32>
    %424 = arith.addf %422, %423 : vector<8x64xf32>
    %425 = arith.negf %424 : vector<8x64xf32>
    %426 = math.exp %425 : vector<8x64xf32>
    %cst_121 = arith.constant 1.000000e+00 : f32
    %427 = vector.broadcast %cst_121 : f32 to vector<8x64xf32>
    %428 = arith.addf %427, %426 : vector<8x64xf32>
    %429 = arith.divf %427, %428 : vector<8x64xf32>
    %430 = vector.extract_strided_slice %429 {offsets = [0, 0], sizes = [8, 32], strides = [1, 1]} : vector<8x64xf32> to vector<8x32xf32>
    %431 = vector.extract_strided_slice %429 {offsets = [0, 32], sizes = [8, 32], strides = [1, 1]} : vector<8x64xf32> to vector<8x32xf32>
    %432 = vector.extract_strided_slice %417 {offsets = [0, 64], sizes = [8, 32], strides = [1, 1]} : vector<8x96xf32> to vector<8x32xf32>
    %433 = vector.extract_strided_slice %421 {offsets = [0, 64], sizes = [8, 32], strides = [1, 1]} : vector<8x96xf32> to vector<8x32xf32>
    %434 = arith.addf %433, %20 : vector<8x32xf32>
    %435 = arith.mulf %430, %434 : vector<8x32xf32>
    %436 = arith.addf %432, %435 : vector<8x32xf32>
    %437 = math.tanh %436 : vector<8x32xf32>
    %438 = arith.subf %388, %437 : vector<8x32xf32>
    %439 = arith.mulf %431, %438 : vector<8x32xf32>
    %440 = arith.addf %437, %439 : vector<8x32xf32>
    %c0_122 = arith.constant 0 : index
    %c0_123 = arith.constant 0 : index
    %441 = vector.load %arg4[%c0_122, %c0_123] : memref<24x32xf32, #tpu.memory_space<vmem>>, vector<8x32xf32>
    tpu.vector_store %arg4[%c0_122, %c0_123], %412 {strides = array<i32>} : memref<24x32xf32, #tpu.memory_space<vmem>>, vector<8x32xf32>,
    %c8 = arith.constant 8 : index
    %c0_124 = arith.constant 0 : index
    %442 = vector.load %arg4[%c8, %c0_124] : memref<24x32xf32, #tpu.memory_space<vmem>>, vector<8x32xf32>
    tpu.vector_store %arg4[%c8, %c0_124], %440 {strides = array<i32>} : memref<24x32xf32, #tpu.memory_space<vmem>>, vector<8x32xf32>,
    %cst_125 = arith.constant 0.000000e+00 : f32
    %443 = vector.broadcast %cst_125 : f32 to vector<8x32xf32>
    %444 = arith.maximumf %440, %443 : vector<8x32xf32>
    %445 = arith.truncf %444 : vector<8x32xf32> to vector<8x32xbf16>
    %c4 = arith.constant 4 : index
    %c0_126 = arith.constant 0 : index
    %c0_127 = arith.constant 0 : index
    %446 = vector.load %arg2[%c4, %c0_126, %c0_127] : memref<5x32x96xbf16, #tpu.memory_space<vmem>>, vector<1x32x96xbf16>
    %447 = vector.shape_cast %446 : vector<1x32x96xbf16> to vector<32x96xbf16>
    %448 = vector.extract_strided_slice %447 {offsets = [0, 0], sizes = [32, 32], strides = [1, 1]} : vector<32x96xbf16> to vector<32x32xbf16>
    %cst_128 = arith.constant dense<0.000000e+00> : vector<8x32xf32>
    %449 = tpu.matmul %445, %448, %cst_128 {dimension_numbers = #tpu.dot_dimension_numbers<[1], [0], [0], [1], [0, 0, 1, 1], [], []>} : vector<8x32xbf16>, vector<32x32xbf16>, vector<8x32xf32> -> vector<8x32xf32>
    %450 = vector.extract_strided_slice %0 {offsets = [2, 0, 0], sizes = [1, 1, 32], strides = [1, 1, 1]} : vector<3x2x96xf32> to vector<1x1x32xf32>
    %451 = vector.shape_cast %450 : vector<1x1x32xf32> to vector<1x32xf32>
    %452 = vector.broadcast %451 : vector<1x32xf32> to vector<8x32xf32>
    %453 = arith.addf %449, %452 : vector<8x32xf32>
    %c16 = arith.constant 16 : index
    %c0_129 = arith.constant 0 : index
    %454 = vector.load %arg4[%c16, %c0_129] : memref<24x32xf32, #tpu.memory_space<vmem>>, vector<8x32xf32>
    tpu.vector_store %arg4[%c16, %c0_129], %453 {strides = array<i32>} : memref<24x32xf32, #tpu.memory_space<vmem>>, vector<8x32xf32>,
    return
  }
}

</mosaic_0001>

<bundles_post_ra>
// kernel: grunet_forward.1
= control target key start
LH: loop header
LB: loop body
LE: loop exit
PB: predicated region body
PF: predicated region fallthrough
CT: control target
= control target key end

     0   :  { %s1579_s29 = smov 64   ;;  %vm66_vm0 = vcmask 261120   ;;  %s1580_s30 = smov 32   ;;  %s1970_s2 = inlined_call_operand.vmem [shape: bf16[5,32,96], index: 2, kind: input, shape index: {}]   ;;  %s1971_s1 = inlined_call_operand.vmem [shape: f32[2,8,32], index: 1, kind: input, shape index: {}]   ;;  %s1972_s3 = inlined_call_operand.vmem [shape: f32[3,2,96], index: 3, kind: input, shape index: {}]   ;;  %s1973_s0 = inlined_call_operand.vmem [shape: bf16[64,32], index: 0, kind: input, shape index: {}]   ;;  %s1974_s4 = inlined_call_operand.vmem [shape: f32[24,32], index: 4, kind: output, shape index: {}]  }
   0x1   :  { %v1471_v0 = vld [vmem:[%s1970_s2 + $0x8] sm:$0xff]  ;;  %v1613_v1 = vld [vmem:[%s1970_s2 + $0x18] sm:$0xff]  ;;  %v1470_v2 = vld [vmem:[%s1970_s2] sm:$0xff] }
   0x2   :  { %85 = vmatpush.bf16.msra.mxu0 %v1471_v0  ;;  %141 = vmatpush.bf16.msra.mxu1 %v1613_v1  ;;  %v1622_v3 = vld [vmem:[%s1970_s2 + $0x10] sm:$0xff]  ;;  %v111_v4 = vld [vmem:[%s1971_s1] sm:$0xff]  ;;  %v1657_v39 = vld [vmem:[%s1970_s2 + $0x38] sm:$0xff] }
   0x3   :  { %v18_v5 = vld [vmem:[%s1972_s3] sm:$0x3]  ;;  %v114_v8 = vpack.c.bf16 %v111_v4, %v111_v4  ;;  %v19_v40 = vld [vmem:[%s1972_s3 + $0x2] sm:$0x3]  ;;  %v1665_v41 = vld [vmem:[%s1970_s2 + $0x28] sm:$0xff]  ;;  %263 = vmatpush.bf16.msra.mxu3 %v1657_v39 }
   0x4   :  { %v109_v6 = vperm.slane %v18_v5, 1  ;;  %v1466_v7 = vld [vmem:[%s1973_s0] sm:$0xff]  ;;  %v1647_v13 = vperm.slane %v18_v5, 0  ;;  %v1671_v42 = vld [vmem:[%s1970_s2 + $0x30] sm:$0xff]  ;;  %v1676_v43 = vld [vmem:[%s1971_s1 + $0x8] sm:$0xff]  ;;  %v110_v44 = vperm.slane %v19_v40, 1  ;;  %229 = vmatpush.bf16.msra.mxu2 %v1665_v41 }
   0x5   :  { %v1682_v45 = vld [vmem:[%s1970_s2 + $0x20] sm:$0xff]  ;;  %v236_v46 = vpack.c.bf16 %v1676_v43, %v1676_v43  ;;  %v1714_v57 = vperm.slane %v19_v40, 0  ;;  %s1581_s1 = smov 96  }
   0x6   :  { %169 = vrot.lane.b32.xlu0 %v109_v6, %s1579_s29  ;;  %86 = vmatpush.bf16.msra.mxu0 %v1470_v2 }
   0x7   :  { %142 = vmatpush.bf16.msra.mxu1 %v1622_v3  ;;  %264 = vmatpush.bf16.msra.mxu3 %v1671_v42 }
   0x8   :  { %230 = vmatpush.bf16.msra.mxu2 %v1682_v45 }
   0x9   :  { %1372 = vmatmul.msk.bf16.vlgmr.msra.gmra.mxu0 %vm66_vm0, %v1466_v7 }
   0xa   :  { %744 = vmatpush.bf16.msrb.mxu0 %v1613_v1  ;;  %1389 = vmatmul.msk.bf16.vlgmr.msra.gmra.mxu1 %vm66_vm0, %v114_v8 }
   0xb   :  { %327 = vmatpush.bf16.msrb.mxu1 %v1613_v1  ;;  %410 = vmatpush.bf16.msrb.mxu3 %v1657_v39 }
   0xc   :  { %390 = vmatpush.bf16.msrb.mxu2 %v1665_v41  ;;  %1416 = vmatmul.msk.bf16.vlgmr.msra.gmra.mxu3 %vm66_vm0, %v236_v46 }
   0xe   :  { %745 = vmatpush.bf16.msrb.mxu0 %v1622_v3 }
   0xf   :  { %328 = vmatpush.bf16.msrb.mxu1 %v1622_v3  ;;  %411 = vmatpush.bf16.msrb.mxu3 %v1671_v42 }
  0x10   :  { %391 = vmatpush.bf16.msrb.mxu2 %v1682_v45 }
  0x12   :  { %946 = vmatpush.bf16.msra.mxu0 %v1665_v41 }
  0x13   :  { %466 = vmatpush.bf16.msra.mxu1 %v1613_v1  ;;  %549 = vmatpush.bf16.msra.mxu3 %v1657_v39 }
  0x16   :  { %947 = vmatpush.bf16.msra.mxu0 %v1682_v45 }
  0x17   :  { %467 = vmatpush.bf16.msra.mxu1 %v1622_v3  ;;  %550 = vmatpush.bf16.msra.mxu3 %v1671_v42 }
  0x78   :  { %v1643_v9 = vpop.permute.xlu0 %169 }
  0x86   :  { %v88_v14 = vpop.f32.mrf.mxu0 }
  0x87   :  { %v144_v10 = vpop.f32.mrf.mxu1  ;;  %v89_v15 = vadd.f32 %v88_v14, %v1647_v13 }
  0x88   :  { %v172_v11 = vadd.f32 %v1643_v9, %v144_v10 }
  0x89   :  { %v148_v16 = vadd.f32 %v144_v10, %v89_v15 }
  0x8a   :  { %174 = vrot.lane.b32.xlu0 %v172_v11, %s1579_s29 }
  0x8b   :  { %v1390_v17 = vmul.f32 -1.442695, %v148_v16 }
  0x8d   :  { %1483 = vpow2.f32 %v1390_v17 }
  0x8f   :  { %v146_v12 = vpop.f32.mrf.mxu1  ;;  %v266_v51 = vpop.f32.mrf.mxu3 }
  0x93   :  { %v1484_v18 = vpop.eup %1483 }
  0x94   :  { %v152_v19 = vadd.f32 1.0, %v1484_v18  ;;  %v90_v18 = vpop.f32.mrf.mxu0 }
  0x96   :  { %1485 = vrcp.f32 %v152_v19  ;;  %v164_v25 = vand.u32 2147483648, %v152_v19  ;;  %vm158_vm2 = vweird.f32 %v152_v19  ;;  %v162_v26 = vand.u32 2147483647, %v152_v19 }
  0x97   :  { %v268_v54 = vpop.f32.mrf.mxu3 }
  0x98   :  { %v165_v28 = vor.u32 1.1754944e-38, %v164_v25  ;;  %vm163_vm4 = vcmp.eq.f32.partialorder %v162_v26, 8.507059e+37 }
  0x9c   :  { %v1486_v20 = vpop.eup %1485 }
  0x9d   :  { %v154_v21 = vmul.f32 %v1486_v20, %v152_v19  ;;  %vm159_vm1 = vweird.f32 %v1486_v20  ;;  %v91_v19 = vadd.f32 %v90_v18, %v1647_v13 }
  0x9e   :  { %vm160_vm3 = vmor %vm158_vm2, %vm159_vm1 }
  0x9f   :  { %v155_v22 = vsub.f32 1.0, %v154_v21 }
  0xa1   :  { %v156_v23 = vmul.f32 %v1486_v20, %v155_v22 }
  0xa3   :  { %v157_v24 = vadd.f32 %v1486_v20, %v156_v23 }
  0xa5   :  { %v161_v27 = vsel %vm160_vm3, %v1486_v20, %v157_v24 }
  0xa6   :  { %v166_v30 = vsel %vm163_vm4, %v165_v28, %v161_v27 }
  0xfc   :  { %v175_v29 = vpop.permute.xlu0 %174 }
  0xfd   :  { %v177_v31 = vmul.f32 %v175_v29, %v166_v30 }
  0xff   :  { %179 = vrot.lane.b32.xlu1 %v177_v31, %s1579_s29 }
 0x171   :  { %v180_v32 = vpop.permute.xlu1 %179 }
 0x172   :  { %v182_v33 = vadd.f32 %v180_v32, %v89_v15 }
 0x174   :  { %1487 = vtanh.f32 %v182_v33 }
 0x17a   :  { %v1488_v34 = vpop.eup %1487 }
 0x17b   :  { %185 = vrot.lane.b32.xlu1 %v1488_v34, %s1579_s29 }
 0x183   :  { %291 = vrot.lane.b32.xlu1 %v110_v44, %s1579_s29 }
 0x1ed   :  { %v186_v35 = vpop.permute.xlu1 %185 }
 0x1ee   :  { %v188_v36 = vsub.f32 %v111_v4, %v186_v35 }
 0x1f0   :  { %190 = vrot.lane.b32.xlu2 %v188_v36, %s1580_s30 }
 0x1f5   :  { %v1703_v50 = vpop.permute.xlu1 %291 }
 0x1f6   :  { %v294_v52 = vadd.f32 %v1703_v50, %v266_v51 }
 0x24a   :  { %v191_v37 = vpop.permute.xlu2 %190 }
 0x24b   :  { %v193_v38 = vmul.f32 %v191_v37, %v166_v30 }
 0x24d   :  { %195 = vrot.lane.b32.xlu2 %v193_v38, %s1580_s30 }
 0x255   :  { %296 = vrot.lane.b32.xlu2 %v294_v52, %s1579_s29 }
 0x2a7   :  { %v196_v47 = vpop.permute.xlu2 %195 }
 0x2a8   :  { %v1698_v48 = vadd.f32 %v1488_v34, %v196_v47 }
 0x2aa   :  { %v199_v49 = vpack.c.bf16 %v1698_v48, %v1698_v48 }
 0x2ac   :  { %206 = vrot.lane.b32.xlu0 %v199_v49, %s1579_s29 }
 0x2af   :  { %v297_v14 = vpop.permute.xlu2 %296 }
 0x31e   :  { %v207_v53 = vpop.permute.xlu0 %206 }
 0x31f   :  { %1403 = vmatmul.msk.bf16.vlgmr.msra.gmra.mxu2 %vm66_vm0, %v207_v53  ;;  %1418 = vmatmul.msk.bf16.vlgmr.msrb.gmra.mxu1 %vm66_vm0, %v207_v53 }
 0x320   :  { %529 = vmatpush.bf16.msra.mxu2 %v1665_v41  ;;  %605 = vmatpush.bf16.msrb.mxu1 %v1613_v1 }
 0x324   :  { %530 = vmatpush.bf16.msra.mxu2 %v1682_v45  ;;  %606 = vmatpush.bf16.msrb.mxu1 %v1622_v3 }
 0x39c   :  { %v330_v55 = vpop.f32.mrf.mxu1 }
 0x39d   :  { %v354_v56 = vadd.f32 %v330_v55, %v1643_v9  ;;  %v334_v20 = vadd.f32 %v330_v55, %v91_v19 }
 0x39f   :  { %356 = vrot.lane.b32.xlu1 %v354_v56, %s1579_s29  ;;  %v1419_v21 = vmul.f32 -1.442695, %v334_v20 }
 0x3a2   :  { %v232_v58 = vpop.f32.mrf.mxu2 }
 0x3a3   :  { %v233_v59 = vadd.f32 %v232_v58, %v1714_v57 }
 0x3a4   :  { %v332_v60 = vpop.f32.mrf.mxu1 }
 0x3a5   :  { %v270_v61 = vadd.f32 %v266_v51, %v233_v59 }
 0x3a7   :  { %v1417_v62 = vmul.f32 -1.442695, %v270_v61 }
 0x3a9   :  { %1489 = vpow2.f32 %v1417_v62 }
 0x3aa   :  { %v234_v63 = vpop.f32.mrf.mxu2 }
 0x3af   :  { %v1490_v0 = vpop.eup %1489 }
 0x3b0   :  { %v274_v2 = vadd.f32 1.0, %v1490_v0 }
 0x3b2   :  { %1491 = vrcp.f32 %v274_v2  ;;  %v286_v7 = vand.u32 2147483648, %v274_v2  ;;  %v284_v10 = vand.u32 2147483647, %v274_v2  ;;  %vm280_vm6 = vweird.f32 %v274_v2 }
 0x3b3   :  { %1493 = vpow2.f32 %v1419_v21 }
 0x3b4   :  { %v287_v12 = vor.u32 1.1754944e-38, %v286_v7  ;;  %vm285_vm8 = vcmp.eq.f32.partialorder %v284_v10, 8.507059e+37 }
 0x3b8   :  { %v1492_v4 = vpop.eup %1491 }
 0x3b9   :  { %v276_v5 = vmul.f32 %v1492_v4, %v274_v2  ;;  %vm281_vm5 = vweird.f32 %v1492_v4  ;;  %v1494_v22 = vpop.eup %1493 }
 0x3ba   :  { %vm282_vm7 = vmor %vm280_vm6, %vm281_vm5  ;;  %v338_v23 = vadd.f32 1.0, %v1494_v22 }
 0x3bb   :  { %v277_v6 = vsub.f32 1.0, %v276_v5 }
 0x3bc   :  { %1495 = vrcp.f32 %v338_v23  ;;  %v350_v29 = vand.u32 2147483648, %v338_v23  ;;  %vm344_vm10 = vweird.f32 %v338_v23  ;;  %v348_v30 = vand.u32 2147483647, %v338_v23 }
 0x3bd   :  { %v278_v8 = vmul.f32 %v1492_v4, %v277_v6 }
 0x3be   :  { %v351_v32 = vor.u32 1.1754944e-38, %v350_v29  ;;  %vm349_vm12 = vcmp.eq.f32.partialorder %v348_v30, 8.507059e+37 }
 0x3bf   :  { %v279_v11 = vadd.f32 %v1492_v4, %v278_v8 }
 0x3c1   :  { %v283_v15 = vsel %vm282_vm7, %v1492_v4, %v279_v11 }
 0x3c2   :  { %v288_v16 = vsel %vm285_vm8, %v287_v12, %v283_v15  ;;  %v1496_v24 = vpop.eup %1495 }
 0x3c3   :  { %v299_v17 = vmul.f32 %v297_v14, %v288_v16  ;;  %v340_v25 = vmul.f32 %v1496_v24, %v338_v23  ;;  %vm345_vm9 = vweird.f32 %v1496_v24 }
 0x3c4   :  { %vm346_vm11 = vmor %vm344_vm10, %vm345_vm9 }
 0x3c5   :  { %301 = vrot.lane.b32.xlu0 %v299_v17, %s1579_s29  ;;  %v341_v26 = vsub.f32 1.0, %v340_v25 }
 0x3c7   :  { %v342_v27 = vmul.f32 %v1496_v24, %v341_v26 }
 0x3c9   :  { %v343_v28 = vadd.f32 %v1496_v24, %v342_v27 }
 0x3cb   :  { %v347_v31 = vsel %vm346_vm11, %v1496_v24, %v343_v28 }
 0x3cc   :  { %v352_v33 = vsel %vm349_vm12, %v351_v32, %v347_v31 }
 0x411   :  { %v357_v34 = vpop.permute.xlu1 %356 }
 0x412   :  { %v359_v35 = vmul.f32 %v357_v34, %v352_v33 }
 0x414   :  { %361 = vrot.lane.b32.xlu0 %v359_v35, %s1579_s29 }
 0x437   :  { %v302_v36 = vpop.permute.xlu0 %301 }
 0x438   :  { %v304_v37 = vadd.f32 %v302_v36, %v233_v59 }
 0x43a   :  { %1497 = vtanh.f32 %v304_v37 }
 0x440   :  { %v1498_v38 = vpop.eup %1497 }
 0x441   :  { %307 = vrot.lane.b32.xlu2 %v1498_v38, %s1579_s29 }
 0x486   :  { %v362_v40 = vpop.permute.xlu0 %361 }
 0x487   :  { %v364_v44 = vadd.f32 %v362_v40, %v91_v19 }
 0x489   :  { %1499 = vtanh.f32 %v364_v44 }
 0x48f   :  { %v1500_v46 = vpop.eup %1499 }
 0x490   :  { %v366_v47 = vsub.f32 %v1698_v48, %v1500_v46 }
 0x492   :  { %368 = vrot.lane.b32.xlu2 %v366_v47, %s1581_s1 }
 0x49b   :  { %v308_v49 = vpop.permute.xlu2 %307 }
 0x49c   :  { %v310_v51 = vsub.f32 %v1676_v43, %v308_v49  ;;  %v1467_v43 = vld [vmem:[%s1973_s0 + $0x8] sm:$0xff] }
 0x49d   :  { %1373 = vmatmul.msk.bf16.gmra.mxu0 %vm66_vm0, %v1467_v43 }
 0x49e   :  { %312 = vrot.lane.b32.xlu1 %v310_v51, %s1580_s30 }
 0x4ec   :  { %v369_v52 = vpop.permute.xlu2 %368 }
 0x4ed   :  { %v371_v53 = vmul.f32 %v369_v52, %v352_v33 }
 0x4ef   :  { %373 = vrot.lane.b32.xlu1 %v371_v53, %s1580_s30 }
 0x510   :  { %v313_v54 = vpop.permute.xlu1 %312 }
 0x511   :  { %v315_v55 = vmul.f32 %v313_v54, %v288_v16 }
 0x513   :  { %317 = vrot.lane.b32.xlu0 %v315_v55, %s1580_s30 }
 0x51a   :  { %v93_v11 = vpop.f32.mrf.mxu0 }
 0x51b   :  { %v94_v12 = vadd.f32 %v93_v11, %v1647_v13 }
 0x561   :  { %v374_v56 = vpop.permute.xlu1 %373 }
 0x562   :  { %v1728_v58 = vadd.f32 %v1500_v46, %v374_v56 }
 0x564   :  { %v377_v48 = vpack.c.bf16 %v1728_v58, %v1728_v58 }
 0x566   :  { %379 = vrot.lane.b32.xlu0 %v377_v48, %s1579_s29 }
 0x585   :  { %v318_v59 = vpop.permute.xlu0 %317 }
 0x586   :  { %v1737_v60 = vadd.f32 %v1498_v38, %v318_v59 }
 0x588   :  { %v397_v61 = vpack.c.bf16 %v1737_v60, %v1737_v60 }
 0x58a   :  { %399 = vrot.lane.b32.xlu2 %v397_v61, %s1579_s29 }
 0x5d8   :  { %v380_v62 = vpop.permute.xlu0 %379 }
 0x5d9   :  { %1420 = vmatmul.msk.bf16.vlgmr.msrb.gmra.mxu2 %vm66_vm0, %v380_v62  ;;  %1423 = vmatmul.msk.bf16.vlgmr.msra.gmra.mxu1 %vm66_vm0, %v380_v62 }
 0x5da   :  { %668 = vmatpush.bf16.msrb.mxu2 %v1665_v41  ;;  %807 = vmatpush.bf16.msra.mxu1 %v1665_v41 }
 0x5de   :  { %669 = vmatpush.bf16.msrb.mxu2 %v1682_v45  ;;  %808 = vmatpush.bf16.msra.mxu1 %v1682_v45 }
 0x5e4   :  { %v400_v63 = vpop.permute.xlu2 %399 }
 0x5e5   :  { %1421 = vmatmul.msk.bf16.vlgmr.msrb.gmra.mxu3 %vm66_vm0, %v400_v63 }
 0x5e6   :  { %688 = vmatpush.bf16.msrb.mxu3 %v1657_v39 }
 0x5ea   :  { %689 = vmatpush.bf16.msrb.mxu3 %v1671_v42 }
 0x656   :  { %v469_v0 = vpop.f32.mrf.mxu1 }
 0x657   :  { %v493_v2 = vadd.f32 %v469_v0, %v1643_v9  ;;  %v473_v14 = vadd.f32 %v469_v0, %v94_v12 }
 0x659   :  { %495 = vrot.lane.b32.xlu2 %v493_v2, %s1579_s29  ;;  %v1424_v15 = vmul.f32 -1.442695, %v473_v14 }
 0x65b   :  { %1501 = vpow2.f32 %v1424_v15 }
 0x65c   :  { %v393_v4 = vpop.f32.mrf.mxu2 }
 0x65d   :  { %v394_v22 = vadd.f32 %v393_v4, %v1714_v57 }
 0x65e   :  { %v471_v5 = vpop.f32.mrf.mxu1 }
 0x661   :  { %v1502_v16 = vpop.eup %1501 }
 0x662   :  { %v477_v17 = vadd.f32 1.0, %v1502_v16 }
 0x664   :  { %v395_v6 = vpop.f32.mrf.mxu2  ;;  %1503 = vrcp.f32 %v477_v17  ;;  %v489_v25 = vand.u32 2147483648, %v477_v17  ;;  %vm483_vm14 = vweird.f32 %v477_v17  ;;  %v487_v26 = vand.u32 2147483647, %v477_v17 }
 0x666   :  { %v490_v29 = vor.u32 1.1754944e-38, %v489_v25  ;;  %vm488_vm1 = vcmp.eq.f32.partialorder %v487_v26, 8.507059e+37 }
 0x668   :  { %v413_v7 = vpop.f32.mrf.mxu3 }
 0x669   :  { %v437_v8 = vadd.f32 %v413_v7, %v1703_v50  ;;  %v417_v23 = vadd.f32 %v413_v7, %v394_v22 }
 0x66a   :  { %v1504_v18 = vpop.eup %1503 }
 0x66b   :  { %439 = vrot.lane.b32.xlu1 %v437_v8, %s1579_s29  ;;  %v479_v19 = vmul.f32 %v1504_v18, %v477_v17  ;;  %vm484_vm13 = vweird.f32 %v1504_v18  ;;  %v1422_v27 = vmul.f32 -1.442695, %v417_v23 }
 0x66c   :  { %vm485_vm15 = vmor %vm483_vm14, %vm484_vm13 }
 0x66d   :  { %v480_v20 = vsub.f32 1.0, %v479_v19  ;;  %1505 = vpow2.f32 %v1422_v27 }
 0x66f   :  { %v481_v21 = vmul.f32 %v1504_v18, %v480_v20 }
 0x670   :  { %v415_v10 = vpop.f32.mrf.mxu3 }
 0x671   :  { %v482_v24 = vadd.f32 %v1504_v18, %v481_v21  ;;  %v95_v21 = vpop.f32.mrf.mxu0 }
 0x673   :  { %v486_v28 = vsel %vm485_vm15, %v1504_v18, %v482_v24  ;;  %v1506_v33 = vpop.eup %1505 }
 0x674   :  { %v491_v31 = vsel %vm488_vm1, %v490_v29, %v486_v28  ;;  %v421_v34 = vadd.f32 1.0, %v1506_v33 }
 0x676   :  { %1507 = vrcp.f32 %v421_v34  ;;  %v433_v44 = vand.u32 2147483648, %v421_v34  ;;  %vm427_vm3 = vweird.f32 %v421_v34  ;;  %v431_v46 = vand.u32 2147483647, %v421_v34 }
 0x678   :  { %v434_v49 = vor.u32 1.1754944e-38, %v433_v44  ;;  %vm432_vm5 = vcmp.eq.f32.partialorder %v431_v46, 8.507059e+37 }
 0x67c   :  { %v1508_v35 = vpop.eup %1507 }
 0x67d   :  { %v423_v36 = vmul.f32 %v1508_v35, %v421_v34  ;;  %vm428_vm2 = vweird.f32 %v1508_v35 }
 0x67e   :  { %vm429_vm4 = vmor %vm427_vm3, %vm428_vm2 }
 0x67f   :  { %v424_v37 = vsub.f32 1.0, %v423_v36 }
 0x681   :  { %v425_v38 = vmul.f32 %v1508_v35, %v424_v37 }
 0x683   :  { %v426_v40 = vadd.f32 %v1508_v35, %v425_v38 }
 0x685   :  { %v430_v47 = vsel %vm429_vm4, %v1508_v35, %v426_v40 }
 0x686   :  { %v435_v51 = vsel %vm432_vm5, %v434_v49, %v430_v47 }
 0x6b3   :  { %v496_v30 = vpop.permute.xlu2 %495 }
 0x6b4   :  { %v498_v32 = vmul.f32 %v496_v30, %v491_v31 }
 0x6b6   :  { %500 = vrot.lane.b32.xlu1 %v498_v32, %s1579_s29 }
 0x6dd   :  { %v440_v52 = vpop.permute.xlu1 %439 }
 0x6de   :  { %v442_v53 = vmul.f32 %v440_v52, %v435_v51 }
 0x6e0   :  { %444 = vrot.lane.b32.xlu0 %v442_v53, %s1579_s29 }
 0x728   :  { %v501_v54 = vpop.permute.xlu1 %500 }
 0x729   :  { %v503_v55 = vadd.f32 %v501_v54, %v94_v12 }
 0x72b   :  { %1509 = vtanh.f32 %v503_v55 }
 0x731   :  { %v1510_v56 = vpop.eup %1509 }
 0x732   :  { %v505_v48 = vsub.f32 %v1728_v58, %v1510_v56 }
 0x734   :  { %507 = vrot.lane.b32.xlu0 %v505_v48, %s1581_s1 }
 0x752   :  { %v445_v43 = vpop.permute.xlu0 %444 }
 0x753   :  { %v447_v59 = vadd.f32 %v445_v43, %v394_v22  ;;  %v96_v22 = vadd.f32 %v95_v21, %v1647_v13 }
 0x755   :  { %1511 = vtanh.f32 %v447_v59 }
 0x75b   :  { %v1512_v61 = vpop.eup %1511 }
 0x75c   :  { %v449_v62 = vsub.f32 %v1737_v60, %v1512_v61 }
 0x75e   :  { %451 = vrot.lane.b32.xlu2 %v449_v62, %s1581_s1 }
 0x7a6   :  { %v508_v63 = vpop.permute.xlu0 %507 }
 0x7a7   :  { %v510_v0 = vmul.f32 %v508_v63, %v491_v31 }
 0x7a9   :  { %512 = vrot.lane.b32.xlu2 %v510_v0, %s1580_s30 }
 0x7b8   :  { %v452_v2 = vpop.permute.xlu2 %451 }
 0x7b9   :  { %v454_v4 = vmul.f32 %v452_v2, %v435_v51 }
 0x7bb   :  { %456 = vrot.lane.b32.xlu1 %v454_v4, %s1580_s30 }
 0x803   :  { %v513_v5 = vpop.permute.xlu2 %512 }
 0x804   :  { %v1765_v58 = vadd.f32 %v1510_v56, %v513_v5 }
 0x806   :  { %v516_v6 = vpack.c.bf16 %v1765_v58, %v1765_v58 }
 0x808   :  { %518 = vrot.lane.b32.xlu1 %v516_v6, %s1579_s29 }
 0x82d   :  { %v457_v7 = vpop.permute.xlu1 %456 }
 0x82e   :  { %v1770_v60 = vadd.f32 %v1512_v61, %v457_v7 }
 0x830   :  { %v536_v8 = vpack.c.bf16 %v1770_v60, %v1770_v60 }
 0x832   :  { %538 = vrot.lane.b32.xlu0 %v536_v8, %s1579_s29 }
 0x87a   :  { %v519_v10 = vpop.permute.xlu1 %518 }
 0x87b   :  { %1425 = vmatmul.msk.bf16.vlgmr.msra.gmra.mxu2 %vm66_vm0, %v519_v10  ;;  %1428 = vmatmul.msk.bf16.vlgmr.msrb.gmra.mxu1 %vm66_vm0, %v519_v10 }
 0x87c   :  { %827 = vmatpush.bf16.msra.mxu2 %v1657_v39  ;;  %966 = vmatpush.bf16.msrb.mxu1 %v1657_v39 }
 0x880   :  { %828 = vmatpush.bf16.msra.mxu2 %v1671_v42  ;;  %967 = vmatpush.bf16.msrb.mxu1 %v1671_v42 }
 0x8a4   :  { %v539_v11 = vpop.permute.xlu0 %538 }
 0x8a5   :  { %1426 = vmatmul.msk.bf16.vlgmr.msra.gmra.mxu3 %vm66_vm0, %v539_v11 }
 0x8a6   :  { %883 = vmatpush.bf16.msra.mxu3 %v1613_v1 }
 0x8aa   :  { %884 = vmatpush.bf16.msra.mxu3 %v1622_v3 }
 0x8f8   :  { %v608_v12 = vpop.f32.mrf.mxu1 }
 0x8f9   :  { %v632_v14 = vadd.f32 %v608_v12, %v1643_v9  ;;  %v612_v23 = vadd.f32 %v608_v12, %v96_v22 }
 0x8fb   :  { %634 = vrot.lane.b32.xlu0 %v632_v14, %s1579_s29  ;;  %v1429_v24 = vmul.f32 -1.442695, %v612_v23 }
 0x8fd   :  { %1513 = vpow2.f32 %v1429_v24 }
 0x8fe   :  { %v532_v15 = vpop.f32.mrf.mxu2 }
 0x8ff   :  { %v533_v27 = vadd.f32 %v532_v15, %v1714_v57 }
 0x900   :  { %v610_v16 = vpop.f32.mrf.mxu1 }
 0x903   :  { %v1514_v25 = vpop.eup %1513 }
 0x904   :  { %v616_v26 = vadd.f32 1.0, %v1514_v25 }
 0x906   :  { %v534_v17 = vpop.f32.mrf.mxu2  ;;  %1515 = vrcp.f32 %v616_v26  ;;  %v628_v37 = vand.u32 2147483648, %v616_v26  ;;  %vm622_vm7 = vweird.f32 %v616_v26  ;;  %v626_v38 = vand.u32 2147483647, %v616_v26 }
 0x908   :  { %v629_v44 = vor.u32 1.1754944e-38, %v628_v37  ;;  %vm627_vm9 = vcmp.eq.f32.partialorder %v626_v38, 8.507059e+37 }
 0x90c   :  { %v1516_v29 = vpop.eup %1515 }
 0x90d   :  { %v618_v31 = vmul.f32 %v1516_v29, %v616_v26  ;;  %vm623_vm6 = vweird.f32 %v1516_v29 }
 0x90e   :  { %vm624_vm8 = vmor %vm622_vm7, %vm623_vm6 }
 0x90f   :  { %v619_v32 = vsub.f32 1.0, %v618_v31 }
 0x911   :  { %v620_v34 = vmul.f32 %v1516_v29, %v619_v32 }
 0x913   :  { %v621_v36 = vadd.f32 %v1516_v29, %v620_v34 }
 0x915   :  { %v625_v40 = vsel %vm624_vm8, %v1516_v29, %v621_v36 }
 0x916   :  { %v630_v47 = vsel %vm627_vm9, %v629_v44, %v625_v40 }
 0x928   :  { %v552_v18 = vpop.f32.mrf.mxu3 }
 0x929   :  { %v576_v19 = vadd.f32 %v552_v18, %v1703_v50  ;;  %v556_v28 = vadd.f32 %v552_v18, %v533_v27  ;;  %v1469_v18 = vld [vmem:[%s1973_s0 + $0x18] sm:$0xff] }
 0x92b   :  { %578 = vrot.lane.b32.xlu2 %v576_v19, %s1579_s29  ;;  %v1427_v30 = vmul.f32 -1.442695, %v556_v28 }
 0x92d   :  { %1517 = vpow2.f32 %v1427_v30 }
 0x930   :  { %v554_v20 = vpop.f32.mrf.mxu3 }
 0x933   :  { %v1518_v33 = vpop.eup %1517 }
 0x934   :  { %v560_v35 = vadd.f32 1.0, %v1518_v33 }
 0x936   :  { %1519 = vrcp.f32 %v560_v35  ;;  %v572_v56 = vand.u32 2147483648, %v560_v35  ;;  %vm566_vm11 = vweird.f32 %v560_v35  ;;  %v570_v48 = vand.u32 2147483647, %v560_v35 }
 0x938   :  { %v573_v59 = vor.u32 1.1754944e-38, %v572_v56  ;;  %vm571_vm13 = vcmp.eq.f32.partialorder %v570_v48, 8.507059e+37 }
 0x93c   :  { %v1520_v51 = vpop.eup %1519 }
 0x93d   :  { %v562_v52 = vmul.f32 %v1520_v51, %v560_v35  ;;  %vm567_vm10 = vweird.f32 %v1520_v51 }
 0x93e   :  { %vm568_vm12 = vmor %vm566_vm11, %vm567_vm10 }
 0x93f   :  { %v563_v53 = vsub.f32 1.0, %v562_v52 }
 0x941   :  { %v564_v54 = vmul.f32 %v1520_v51, %v563_v53 }
 0x943   :  { %v565_v55 = vadd.f32 %v1520_v51, %v564_v54 }
 0x945   :  { %v569_v43 = vsel %vm568_vm12, %v1520_v51, %v565_v55 }
 0x946   :  { %v574_v62 = vsel %vm571_vm13, %v573_v59, %v569_v43 }
 0x96d   :  { %v635_v46 = vpop.permute.xlu0 %634 }
 0x96e   :  { %v637_v49 = vmul.f32 %v635_v46, %v630_v47 }
 0x970   :  { %639 = vrot.lane.b32.xlu2 %v637_v49, %s1579_s29 }
 0x985   :  { %v579_v61 = vpop.permute.xlu2 %578 }
 0x986   :  { %v581_v63 = vmul.f32 %v579_v61, %v574_v62 }
 0x988   :  { %583 = vrot.lane.b32.xlu1 %v581_v63, %s1579_s29 }
 0x9ca   :  { %v640_v0 = vpop.permute.xlu2 %639 }
 0x9cb   :  { %v642_v2 = vadd.f32 %v640_v0, %v96_v22 }
 0x9cd   :  { %1521 = vtanh.f32 %v642_v2 }
 0x9d3   :  { %v1522_v4 = vpop.eup %1521 }
 0x9d4   :  { %v644_v5 = vsub.f32 %v1765_v58, %v1522_v4  ;;  %v1468_v58 = vld [vmem:[%s1973_s0 + $0x10] sm:$0xff] }
 0x9d5   :  { %1374 = vmatmul.msk.bf16.gmra.mxu0 %vm66_vm0, %v1468_v58 }
 0x9d6   :  { %646 = vrot.lane.b32.xlu1 %v644_v5, %s1581_s1 }
 0x9e5   :  { %1375 = vmatmul.msk.bf16.gmra.mxu0 %vm66_vm0, %v1469_v18 }
 0x9fa   :  { %v584_v6 = vpop.permute.xlu1 %583 }
 0x9fb   :  { %v586_v7 = vadd.f32 %v584_v6, %v533_v27 }
 0x9fd   :  { %1523 = vtanh.f32 %v586_v7 }
 0xa03   :  { %v1524_v8 = vpop.eup %1523 }
 0xa04   :  { %v588_v10 = vsub.f32 %v1770_v60, %v1524_v8 }
 0xa06   :  { %590 = vrot.lane.b32.xlu0 %v588_v10, %s1581_s1 }
 0xa48   :  { %v647_v11 = vpop.permute.xlu1 %646 }
 0xa49   :  { %v649_v12 = vmul.f32 %v647_v11, %v630_v47 }
 0xa4b   :  { %651 = vrot.lane.b32.xlu0 %v649_v12, %s1580_s30 }
 0xa52   :  { %v98_v24 = vpop.f32.mrf.mxu0 }
 0xa53   :  { %v99_v36 = vadd.f32 %v98_v24, %v1647_v13 }
 0xa5a   :  { %v1825_v25 = vpop.f32.mrf.mxu0 }
 0xa62   :  { %v1827_v26 = vpop.f32.mrf.mxu0 }
 0xa6a   :  { %v1829_v27 = vpop.f32.mrf.mxu0 }
 0xa78   :  { %v591_v14 = vpop.permute.xlu0 %590 }
 0xa79   :  { %v593_v15 = vmul.f32 %v591_v14, %v574_v62 }
 0xa7b   :  { %595 = vrot.lane.b32.xlu2 %v593_v15, %s1580_s30 }
 0xabd   :  { %v652_v16 = vpop.permute.xlu0 %651 }
 0xabe   :  { %v1802_v17 = vadd.f32 %v1522_v4, %v652_v16 }
 0xac0   :  { %v655_v60 = vpack.c.bf16 %v1802_v17, %v1802_v17 }
 0xac2   :  { %657 = vrot.lane.b32.xlu2 %v655_v60, %s1579_s29 }
 0xad5   :  { %v596_v19 = vpop.permute.xlu2 %595 }
 0xad6   :  { %v1811_v20 = vadd.f32 %v1524_v8, %v596_v19 }
 0xad8   :  { %v675_v21 = vpack.c.bf16 %v1811_v20, %v1811_v20 }
 0xada   :  { %677 = vrot.lane.b32.xlu1 %v675_v21, %s1579_s29 }
 0xb1c   :  { %v658_v22 = vpop.permute.xlu2 %657 }
 0xb1d   :  { %1430 = vmatmul.msk.bf16.vlgmr.msrb.gmra.mxu2 %vm66_vm0, %v658_v22  ;;  %1433 = vmatmul.msk.bf16.vlgmr.msrb.gmra.mxu0 %vm66_vm0, %v658_v22 }
 0xb1e   :  { %1022 = vmatpush.bf16.msrb.mxu2 %v1613_v1  ;;  %1105 = vmatpush.bf16.msrb.mxu0 %v1657_v39 }
 0xb22   :  { %1023 = vmatpush.bf16.msrb.mxu2 %v1622_v3  ;;  %1106 = vmatpush.bf16.msrb.mxu0 %v1671_v42 }
 0xb4c   :  { %v678_v23 = vpop.permute.xlu1 %677 }
 0xb4d   :  { %1431 = vmatmul.msk.bf16.vlgmr.msrb.gmra.mxu3 %vm66_vm0, %v678_v23 }
 0xb4e   :  { %1085 = vmatpush.bf16.msrb.mxu3 %v1665_v41 }
 0xb52   :  { %1086 = vmatpush.bf16.msrb.mxu3 %v1682_v45 }
 0xb9a   :  { %v747_v28 = vpop.f32.mrf.mxu0 }
 0xb9b   :  { %v771_v29 = vadd.f32 %v747_v28, %v1643_v9  ;;  %v751_v37 = vadd.f32 %v747_v28, %v99_v36 }
 0xb9d   :  { %773 = vrot.lane.b32.xlu0 %v771_v29, %s1579_s29  ;;  %v1434_v38 = vmul.f32 -1.442695, %v751_v37 }
 0xb9f   :  { %1525 = vpow2.f32 %v1434_v38 }
 0xba0   :  { %v671_v30 = vpop.f32.mrf.mxu2 }
 0xba1   :  { %v672_v61 = vadd.f32 %v671_v30, %v1714_v57 }
 0xba2   :  { %v749_v31 = vpop.f32.mrf.mxu0 }
 0xba5   :  { %v1526_v40 = vpop.eup %1525 }
 0xba6   :  { %v755_v44 = vadd.f32 1.0, %v1526_v40 }
 0xba8   :  { %v673_v32 = vpop.f32.mrf.mxu2  ;;  %1527 = vrcp.f32 %v755_v44  ;;  %v767_v53 = vand.u32 2147483648, %v755_v44  ;;  %vm761_vm15 = vweird.f32 %v755_v44  ;;  %v765_v54 = vand.u32 2147483647, %v755_v44 }
 0xbaa   :  { %v768_v56 = vor.u32 1.1754944e-38, %v767_v53  ;;  %vm766_vm2 = vcmp.eq.f32.partialorder %v765_v54, 8.507059e+37 }
 0xbae   :  { %v1528_v46 = vpop.eup %1527 }
 0xbaf   :  { %v757_v47 = vmul.f32 %v1528_v46, %v755_v44  ;;  %vm762_vm14 = vweird.f32 %v1528_v46 }
 0xbb0   :  { %vm763_vm1 = vmor %vm761_vm15, %vm762_vm14 }
 0xbb1   :  { %v758_v49 = vsub.f32 1.0, %v757_v47 }
 0xbb3   :  { %v759_v51 = vmul.f32 %v1528_v46, %v758_v49 }
 0xbb5   :  { %v760_v52 = vadd.f32 %v1528_v46, %v759_v51 }
 0xbb7   :  { %v764_v55 = vsel %vm763_vm1, %v1528_v46, %v760_v52 }
 0xbb8   :  { %v769_v43 = vsel %vm766_vm2, %v768_v56, %v764_v55 }
 0xbd0   :  { %v691_v33 = vpop.f32.mrf.mxu3 }
 0xbd1   :  { %v715_v34 = vadd.f32 %v691_v33, %v1703_v50  ;;  %v695_v62 = vadd.f32 %v691_v33, %v672_v61 }
 0xbd3   :  { %717 = vrot.lane.b32.xlu1 %v715_v34, %s1579_s29  ;;  %v1432_v63 = vmul.f32 -1.442695, %v695_v62 }
 0xbd5   :  { %1529 = vpow2.f32 %v1432_v63 }
 0xbd8   :  { %v693_v35 = vpop.f32.mrf.mxu3 }
 0xbdb   :  { %v1530_v0 = vpop.eup %1529 }
 0xbdc   :  { %v699_v2 = vadd.f32 1.0, %v1530_v0 }
 0xbde   :  { %1531 = vrcp.f32 %v699_v2  ;;  %v711_v10 = vand.u32 2147483648, %v699_v2  ;;  %vm705_vm4 = vweird.f32 %v699_v2  ;;  %v709_v11 = vand.u32 2147483647, %v699_v2 }
 0xbe0   :  { %v712_v14 = vor.u32 1.1754944e-38, %v711_v10  ;;  %vm710_vm6 = vcmp.eq.f32.partialorder %v709_v11, 8.507059e+37 }
 0xbe4   :  { %v1532_v4 = vpop.eup %1531 }
 0xbe5   :  { %v701_v5 = vmul.f32 %v1532_v4, %v699_v2  ;;  %vm706_vm3 = vweird.f32 %v1532_v4 }
 0xbe6   :  { %vm707_vm5 = vmor %vm705_vm4, %vm706_vm3 }
 0xbe7   :  { %v702_v6 = vsub.f32 1.0, %v701_v5 }
 0xbe9   :  { %v703_v7 = vmul.f32 %v1532_v4, %v702_v6 }
 0xbeb   :  { %v704_v8 = vadd.f32 %v1532_v4, %v703_v7 }
 0xbed   :  { %v708_v12 = vsel %vm707_vm5, %v1532_v4, %v704_v8 }
 0xbee   :  { %v713_v58 = vsel %vm710_vm6, %v712_v14, %v708_v12 }
 0xc0f   :  { %v774_v48 = vpop.permute.xlu0 %773 }
 0xc10   :  { %v776_v59 = vmul.f32 %v774_v48, %v769_v43 }
 0xc12   :  { %778 = vrot.lane.b32.xlu2 %v776_v59, %s1579_s29 }
 0xc45   :  { %v718_v15 = vpop.permute.xlu1 %717 }
 0xc46   :  { %v720_v16 = vmul.f32 %v718_v15, %v713_v58 }
 0xc48   :  { %722 = vrot.lane.b32.xlu0 %v720_v16, %s1579_s29 }
 0xc6c   :  { %v779_v60 = vpop.permute.xlu2 %778 }
 0xc6d   :  { %v781_v18 = vadd.f32 %v779_v60, %v99_v36 }
 0xc6f   :  { %1533 = vtanh.f32 %v781_v18 }
 0xc75   :  { %v1534_v19 = vpop.eup %1533 }
 0xc76   :  { %v783_v21 = vsub.f32 %v1802_v17, %v1534_v19 }
 0xc78   :  { %785 = vrot.lane.b32.xlu1 %v783_v21, %s1581_s1 }
 0xcba   :  { %v723_v22 = vpop.permute.xlu0 %722 }
 0xcbb   :  { %v725_v23 = vadd.f32 %v723_v22, %v672_v61 }
 0xcbd   :  { %1535 = vtanh.f32 %v725_v23 }
 0xcc3   :  { %v1536_v24 = vpop.eup %1535 }
 0xcc4   :  { %v727_v28 = vsub.f32 %v1811_v20, %v1536_v24 }
 0xcc6   :  { %729 = vrot.lane.b32.xlu2 %v727_v28, %s1581_s1 }
 0xcea   :  { %v786_v29 = vpop.permute.xlu1 %785 }
 0xceb   :  { %v788_v30 = vmul.f32 %v786_v29, %v769_v43 }
 0xced   :  { %790 = vrot.lane.b32.xlu0 %v788_v30, %s1580_s30 }
 0xd20   :  { %v730_v31 = vpop.permute.xlu2 %729 }
 0xd21   :  { %v732_v32 = vmul.f32 %v730_v31, %v713_v58 }
 0xd23   :  { %734 = vrot.lane.b32.xlu1 %v732_v32, %s1580_s30 }
 0xd5f   :  { %v791_v33 = vpop.permute.xlu0 %790 }
 0xd60   :  { %v1845_v17 = vadd.f32 %v1534_v19, %v791_v33 }
 0xd62   :  { %v794_v34 = vpack.c.bf16 %v1845_v17, %v1845_v17 }
 0xd64   :  { %796 = vrot.lane.b32.xlu2 %v794_v34, %s1579_s29 }
 0xd95   :  { %v735_v35 = vpop.permute.xlu1 %734 }
 0xd96   :  { %v1850_v20 = vadd.f32 %v1536_v24, %v735_v35 }
 0xd98   :  { %v814_v36 = vpack.c.bf16 %v1850_v20, %v1850_v20 }
 0xd9a   :  { %816 = vrot.lane.b32.xlu0 %v814_v36, %s1579_s29 }
 0xdbe   :  { %v797_v37 = vpop.permute.xlu2 %796 }
 0xdbf   :  { %1435 = vmatmul.msk.bf16.vlgmr.msra.gmra.mxu1 %vm66_vm0, %v797_v37  ;;  %1438 = vmatmul.msk.bf16.vlgmr.msra.gmra.mxu3 %vm66_vm0, %v797_v37 }
 0xdc0   :  { %1161 = vmatpush.bf16.msra.mxu1 %v1613_v1  ;;  %1244 = vmatpush.bf16.msra.mxu3 %v1657_v39 }
 0xdc4   :  { %1162 = vmatpush.bf16.msra.mxu1 %v1622_v3  ;;  %1245 = vmatpush.bf16.msra.mxu3 %v1671_v42  ;;  %v101_v3 = vadd.f32 %v1825_v25, %v1647_v13 }
 0xe0c   :  { %v817_v38 = vpop.permute.xlu0 %816 }
 0xe0d   :  { %1436 = vmatmul.msk.bf16.vlgmr.msra.gmra.mxu2 %vm66_vm0, %v817_v38 }
 0xe0e   :  { %1224 = vmatpush.bf16.msra.mxu2 %v1665_v41 }
 0xe12   :  { %1225 = vmatpush.bf16.msra.mxu2 %v1682_v45 }
 0xe3c   :  { %v810_v40 = vpop.f32.mrf.mxu1 }
 0xe3d   :  { %v811_v2 = vadd.f32 %v810_v40, %v1714_v57 }
 0xe42   :  { %v886_v44 = vpop.f32.mrf.mxu3 }
 0xe43   :  { %v910_v46 = vadd.f32 %v886_v44, %v1643_v9  ;;  %v890_v39 = vadd.f32 %v886_v44, %v101_v3 }
 0xe44   :  { %v812_v47 = vpop.f32.mrf.mxu1 }
 0xe45   :  { %912 = vrot.lane.b32.xlu1 %v910_v46, %s1579_s29  ;;  %v1439_v42 = vmul.f32 -1.442695, %v890_v39 }
 0xe47   :  { %1537 = vpow2.f32 %v1439_v42 }
 0xe4a   :  { %v888_v1 = vpop.f32.mrf.mxu3 }
 0xe4d   :  { %v1538_v41 = vpop.eup %1537 }
 0xe4e   :  { %v894_v45 = vadd.f32 1.0, %v1538_v41 }
 0xe50   :  { %1539 = vrcp.f32 %v894_v45  ;;  %v906_v43 = vand.u32 2147483648, %v894_v45  ;;  %vm900_vm8 = vweird.f32 %v894_v45  ;;  %v904_v25 = vand.u32 2147483647, %v894_v45 }
 0xe52   :  { %v907_v61 = vor.u32 1.1754944e-38, %v906_v43  ;;  %vm905_vm10 = vcmp.eq.f32.partialorder %v904_v25, 8.507059e+37 }
 0xe56   :  { %v1540_v53 = vpop.eup %1539 }
 0xe57   :  { %v896_v54 = vmul.f32 %v1540_v53, %v894_v45  ;;  %vm901_vm7 = vweird.f32 %v1540_v53 }
 0xe58   :  { %vm902_vm9 = vmor %vm900_vm8, %vm901_vm7 }
 0xe59   :  { %v897_v55 = vsub.f32 1.0, %v896_v54 }
 0xe5b   :  { %v898_v56 = vmul.f32 %v1540_v53, %v897_v55 }
 0xe5d   :  { %v899_v48 = vadd.f32 %v1540_v53, %v898_v56 }
 0xe5f   :  { %v903_v59 = vsel %vm902_vm9, %v1540_v53, %v899_v48 }
 0xe60   :  { %v908_v63 = vsel %vm905_vm10, %v907_v61, %v903_v59 }
 0xe90   :  { %v830_v49 = vpop.f32.mrf.mxu2 }
 0xe91   :  { %v854_v51 = vadd.f32 %v830_v49, %v1703_v50  ;;  %v834_v4 = vadd.f32 %v830_v49, %v811_v2 }
 0xe93   :  { %856 = vrot.lane.b32.xlu2 %v854_v51, %s1579_s29  ;;  %v1437_v5 = vmul.f32 -1.442695, %v834_v4 }
 0xe95   :  { %1541 = vpow2.f32 %v1437_v5 }
 0xe98   :  { %v832_v52 = vpop.f32.mrf.mxu2 }
 0xe99   :  { %v104_v52 = vadd.f32 %v1827_v26, %v1647_v13 }
 0xe9b   :  { %v1542_v6 = vpop.eup %1541 }
 0xe9c   :  { %v838_v7 = vadd.f32 1.0, %v1542_v6 }
 0xe9e   :  { %1543 = vrcp.f32 %v838_v7  ;;  %v850_v15 = vand.u32 2147483648, %v838_v7  ;;  %vm844_vm12 = vweird.f32 %v838_v7  ;;  %v848_v58 = vand.u32 2147483647, %v838_v7 }
 0xea0   :  { %v851_v60 = vor.u32 1.1754944e-38, %v850_v15  ;;  %vm849_vm14 = vcmp.eq.f32.partialorder %v848_v58, 8.507059e+37 }
 0xea4   :  { %v1544_v8 = vpop.eup %1543 }
 0xea5   :  { %v840_v10 = vmul.f32 %v1544_v8, %v838_v7  ;;  %vm845_vm11 = vweird.f32 %v1544_v8 }
 0xea6   :  { %vm846_vm13 = vmor %vm844_vm12, %vm845_vm11 }
 0xea7   :  { %v841_v11 = vsub.f32 1.0, %v840_v10 }
 0xea9   :  { %v842_v12 = vmul.f32 %v1544_v8, %v841_v11 }
 0xeab   :  { %v843_v14 = vadd.f32 %v1544_v8, %v842_v12 }
 0xead   :  { %v847_v16 = vsel %vm846_vm13, %v1544_v8, %v843_v14 }
 0xeae   :  { %v852_v19 = vsel %vm849_vm14, %v851_v60, %v847_v16 }
 0xeb7   :  { %v913_v62 = vpop.permute.xlu1 %912 }
 0xeb8   :  { %v915_v0 = vmul.f32 %v913_v62, %v908_v63 }
 0xeba   :  { %917 = vrot.lane.b32.xlu0 %v915_v0, %s1579_s29 }
 0xeed   :  { %v857_v18 = vpop.permute.xlu2 %856 }
 0xeee   :  { %v859_v21 = vmul.f32 %v857_v18, %v852_v19 }
 0xef0   :  { %861 = vrot.lane.b32.xlu1 %v859_v21, %s1579_s29 }
 0xf2c   :  { %v918_v22 = vpop.permute.xlu0 %917 }
 0xf2d   :  { %v920_v23 = vadd.f32 %v918_v22, %v101_v3 }
 0xf2f   :  { %1545 = vtanh.f32 %v920_v23 }
 0xf35   :  { %v1546_v24 = vpop.eup %1545 }
 0xf36   :  { %v922_v28 = vsub.f32 %v1845_v17, %v1546_v24 }
 0xf38   :  { %924 = vrot.lane.b32.xlu2 %v922_v28, %s1581_s1 }
 0xf62   :  { %v862_v29 = vpop.permute.xlu1 %861 }
 0xf63   :  { %v864_v30 = vadd.f32 %v862_v29, %v811_v2 }
 0xf65   :  { %1547 = vtanh.f32 %v864_v30 }
 0xf6b   :  { %v1548_v31 = vpop.eup %1547 }
 0xf6c   :  { %v866_v32 = vsub.f32 %v1850_v20, %v1548_v31 }
 0xf6e   :  { %868 = vrot.lane.b32.xlu0 %v866_v32, %s1581_s1 }
 0xf92   :  { %v925_v33 = vpop.permute.xlu2 %924 }
 0xf93   :  { %v927_v34 = vmul.f32 %v925_v33, %v908_v63 }
 0xf95   :  { %929 = vrot.lane.b32.xlu1 %v927_v34, %s1580_s30 }
 0xfe0   :  { %v869_v35 = vpop.permute.xlu0 %868 }
 0xfe1   :  { %v871_v36 = vmul.f32 %v869_v35, %v852_v19 }
 0xfe3   :  { %873 = vrot.lane.b32.xlu2 %v871_v36, %s1580_s30 }
0x1007   :  { %v930_v37 = vpop.permute.xlu1 %929 }
0x1008   :  { %v1879_v17 = vadd.f32 %v1546_v24, %v930_v37 }
0x100a   :  { %v933_v38 = vpack.c.bf16 %v1879_v17, %v1879_v17 }
0x100c   :  { %935 = vrot.lane.b32.xlu0 %v933_v38, %s1579_s29 }
0x103d   :  { %v874_v40 = vpop.permute.xlu2 %873 }
0x103e   :  { %v1884_v20 = vadd.f32 %v1548_v31, %v874_v40 }
0x1040   :  { %v953_v44 = vpack.c.bf16 %v1884_v20, %v1884_v20 }
0x1042   :  { %955 = vrot.lane.b32.xlu1 %v953_v44, %s1579_s29 }
0x107e   :  { %v936_v46 = vpop.permute.xlu0 %935 }
0x107f   :  { %1440 = vmatmul.msk.bf16.vlgmr.msra.gmra.mxu0 %vm66_vm0, %v936_v46  ;;  %1443 = vmatmul.msk.bf16.vlgmr.msrb.gmra.mxu2 %vm66_vm0, %v936_v46 }
0x10b4   :  { %v956_v47 = vpop.permute.xlu1 %955 }
0x10b5   :  { %1441 = vmatmul.msk.bf16.vlgmr.msrb.gmra.mxu1 %vm66_vm0, %v956_v47 }
0x10fc   :  { %v949_v1 = vpop.f32.mrf.mxu0 }
0x10fd   :  { %v950_v48 = vadd.f32 %v949_v1, %v1714_v57 }
0x1102   :  { %v1025_v3 = vpop.f32.mrf.mxu2 }
0x1103   :  { %v1049_v39 = vadd.f32 %v1025_v3, %v1643_v9  ;;  %v1029_v53 = vadd.f32 %v1025_v3, %v104_v52 }
0x1104   :  { %v951_v42 = vpop.f32.mrf.mxu0 }
0x1105   :  { %1051 = vrot.lane.b32.xlu0 %v1049_v39, %s1579_s29  ;;  %v1444_v54 = vmul.f32 -1.442695, %v1029_v53 }
0x1107   :  { %1549 = vpow2.f32 %v1444_v54 }
0x110a   :  { %v1027_v49 = vpop.f32.mrf.mxu2 }
0x110d   :  { %v1550_v55 = vpop.eup %1549 }
0x110e   :  { %v1033_v56 = vadd.f32 1.0, %v1550_v55  ;;  %v106_v55 = vadd.f32 %v1829_v27, %v1647_v13 }
0x1110   :  { %1551 = vrcp.f32 %v1033_v56  ;;  %v1045_v26 = vand.u32 2147483648, %v1033_v56  ;;  %vm1039_vm1 = vweird.f32 %v1033_v56  ;;  %v1043_v5 = vand.u32 2147483647, %v1033_v56 }
0x1112   :  { %v1046_v7 = vor.u32 1.1754944e-38, %v1045_v26  ;;  %vm1044_vm3 = vcmp.eq.f32.partialorder %v1043_v5, 8.507059e+37 }
0x1116   :  { %v1552_v25 = vpop.eup %1551 }
0x1117   :  { %v1035_v61 = vmul.f32 %v1552_v25, %v1033_v56  ;;  %vm1040_vm15 = vweird.f32 %v1552_v25 }
0x1118   :  { %vm1041_vm2 = vmor %vm1039_vm1, %vm1040_vm15 }
0x1119   :  { %v1036_v62 = vsub.f32 1.0, %v1035_v61 }
0x111b   :  { %v1037_v0 = vmul.f32 %v1552_v25, %v1036_v62 }
0x111d   :  { %v1038_v4 = vadd.f32 %v1552_v25, %v1037_v0 }
0x111f   :  { %v1042_v6 = vsel %vm1041_vm2, %v1552_v25, %v1038_v4 }
0x1120   :  { %v1047_v10 = vsel %vm1044_vm3, %v1046_v7, %v1042_v6 }
0x1132   :  { %v969_v51 = vpop.f32.mrf.mxu1 }
0x1133   :  { %v993_v41 = vadd.f32 %v969_v51, %v1703_v50  ;;  %v973_v43 = vadd.f32 %v969_v51, %v950_v48 }
0x1135   :  { %995 = vrot.lane.b32.xlu2 %v993_v41, %s1579_s29  ;;  %v1442_v59 = vmul.f32 -1.442695, %v973_v43 }
0x1137   :  { %1553 = vpow2.f32 %v1442_v59 }
0x113a   :  { %v971_v45 = vpop.f32.mrf.mxu1 }
0x113d   :  { %v1554_v63 = vpop.eup %1553 }
0x113e   :  { %v977_v2 = vadd.f32 1.0, %v1554_v63 }
0x1140   :  { %1555 = vrcp.f32 %v977_v2  ;;  %v989_v60 = vand.u32 2147483648, %v977_v2  ;;  %vm983_vm5 = vweird.f32 %v977_v2  ;;  %v987_v18 = vand.u32 2147483647, %v977_v2 }
0x1142   :  { %v990_v21 = vor.u32 1.1754944e-38, %v989_v60  ;;  %vm988_vm7 = vcmp.eq.f32.partialorder %v987_v18, 8.507059e+37 }
0x1146   :  { %v1556_v12 = vpop.eup %1555 }
0x1147   :  { %v979_v14 = vmul.f32 %v1556_v12, %v977_v2  ;;  %vm984_vm4 = vweird.f32 %v1556_v12 }
0x1148   :  { %vm985_vm6 = vmor %vm983_vm5, %vm984_vm4 }
0x1149   :  { %v980_v15 = vsub.f32 1.0, %v979_v14 }
0x114b   :  { %v981_v58 = vmul.f32 %v1556_v12, %v980_v15 }
0x114d   :  { %v982_v16 = vadd.f32 %v1556_v12, %v981_v58 }
0x114f   :  { %v986_v19 = vsel %vm985_vm6, %v1556_v12, %v982_v16 }
0x1150   :  { %v991_v23 = vsel %vm988_vm7, %v990_v21, %v986_v19 }
0x1177   :  { %v1052_v8 = vpop.permute.xlu0 %1051 }
0x1178   :  { %v1054_v11 = vmul.f32 %v1052_v8, %v1047_v10 }
0x117a   :  { %1056 = vrot.lane.b32.xlu2 %v1054_v11, %s1579_s29 }
0x118f   :  { %v996_v22 = vpop.permute.xlu2 %995 }
0x1190   :  { %v998_v24 = vmul.f32 %v996_v22, %v991_v23 }
0x1192   :  { %1000 = vrot.lane.b32.xlu1 %v998_v24, %s1579_s29 }
0x11d4   :  { %v1057_v28 = vpop.permute.xlu2 %1056 }
0x11d5   :  { %v1059_v29 = vadd.f32 %v1057_v28, %v104_v52 }
0x11d7   :  { %1557 = vtanh.f32 %v1059_v29 }
0x11dd   :  { %v1558_v30 = vpop.eup %1557 }
0x11de   :  { %v1061_v31 = vsub.f32 %v1879_v17, %v1558_v30 }
0x11e0   :  { %1063 = vrot.lane.b32.xlu1 %v1061_v31, %s1581_s1 }
0x1204   :  { %v1001_v32 = vpop.permute.xlu1 %1000 }
0x1205   :  { %v1003_v33 = vadd.f32 %v1001_v32, %v950_v48 }
0x1207   :  { %1559 = vtanh.f32 %v1003_v33 }
0x120d   :  { %v1560_v34 = vpop.eup %1559 }
0x120e   :  { %v1005_v35 = vsub.f32 %v1884_v20, %v1560_v34 }
0x1210   :  { %1007 = vrot.lane.b32.xlu0 %v1005_v35, %s1581_s1 }
0x1252   :  { %v1064_v36 = vpop.permute.xlu1 %1063 }
0x1253   :  { %v1066_v37 = vmul.f32 %v1064_v36, %v1047_v10 }
0x1255   :  { %1068 = vrot.lane.b32.xlu0 %v1066_v37, %s1580_s30 }
0x1282   :  { %v1008_v38 = vpop.permute.xlu0 %1007 }
0x1283   :  { %v1010_v40 = vmul.f32 %v1008_v38, %v991_v23 }
0x1285   :  { %1012 = vrot.lane.b32.xlu2 %v1010_v40, %s1580_s30 }
0x12c7   :  { %v1069_v44 = vpop.permute.xlu0 %1068 }
0x12c8   :  { %v1907_v17 = vadd.f32 %v1558_v30, %v1069_v44 }
0x12ca   :  { %v1072_v46 = vpack.c.bf16 %v1907_v17, %v1907_v17 }
0x12cc   :  { %1074 = vrot.lane.b32.xlu2 %v1072_v46, %s1579_s29 }
0x12df   :  { %v1013_v47 = vpop.permute.xlu2 %1012 }
0x12e0   :  { %v1912_v20 = vadd.f32 %v1560_v34, %v1013_v47 }
0x12e2   :  { %v1092_v1 = vpack.c.bf16 %v1912_v20, %v1912_v20 }
0x12e4   :  { %1094 = vrot.lane.b32.xlu1 %v1092_v1, %s1579_s29 }
0x1326   :  { %v1075_v3 = vpop.permute.xlu2 %1074 }
0x1327   :  { %1445 = vmatmul.msk.bf16.vlgmr.msrb.gmra.mxu3 %vm66_vm0, %v1075_v3  ;;  %1448 = vmatmul.msk.bf16.vlgmr.msra.gmra.mxu1 %vm66_vm0, %v1075_v3 }
0x1356   :  { %v1095_v39 = vpop.permute.xlu1 %1094 }
0x1357   :  { %1446 = vmatmul.msk.bf16.vlgmr.msrb.gmra.mxu0 %vm66_vm0, %v1095_v39 }
0x13a4   :  { %v1164_v42 = vpop.f32.mrf.mxu1 }
0x13a5   :  { %v1188_v49 = vadd.f32 %v1164_v42, %v1643_v9  ;;  %v1168_v56 = vadd.f32 %v1164_v42, %v106_v55 }
0x13a7   :  { %1190 = vrot.lane.b32.xlu1 %v1188_v49, %s1579_s29  ;;  %v1449_v48 = vmul.f32 -1.442695, %v1168_v56 }
0x13a9   :  { %1561 = vpow2.f32 %v1449_v48 }
0x13aa   :  { %v1088_v51 = vpop.f32.mrf.mxu3 }
0x13ab   :  { %v1089_v4 = vadd.f32 %v1088_v51, %v1714_v57 }
0x13ac   :  { %v1166_v41 = vpop.f32.mrf.mxu1 }
0x13af   :  { %v1562_v43 = vpop.eup %1561 }
0x13b0   :  { %v1172_v25 = vadd.f32 1.0, %v1562_v43 }
0x13b2   :  { %v1090_v45 = vpop.f32.mrf.mxu3  ;;  %1563 = vrcp.f32 %v1172_v25  ;;  %v1184_v0 = vand.u32 2147483648, %v1172_v25  ;;  %vm1178_vm9 = vweird.f32 %v1172_v25  ;;  %v1182_v2 = vand.u32 2147483647, %v1172_v25 }
0x13b4   :  { %v1185_v13 = vor.u32 1.1754944e-38, %v1184_v0  ;;  %vm1183_vm11 = vcmp.eq.f32.partialorder %v1182_v2, 8.507059e+37 }
0x13b8   :  { %v1564_v9 = vpop.eup %1563 }
0x13b9   :  { %v1174_v59 = vmul.f32 %v1564_v9, %v1172_v25  ;;  %vm1179_vm8 = vweird.f32 %v1564_v9 }
0x13ba   :  { %vm1180_vm10 = vmor %vm1178_vm9, %vm1179_vm8 }
0x13bb   :  { %v1175_v61 = vsub.f32 1.0, %v1174_v59 }
0x13bd   :  { %v1176_v62 = vmul.f32 %v1564_v9, %v1175_v61 }
0x13bf   :  { %v1177_v63 = vadd.f32 %v1564_v9, %v1176_v62 }
0x13c1   :  { %v1181_v26 = vsel %vm1180_vm10, %v1564_v9, %v1177_v63 }
0x13c2   :  { %v1186_v5 = vsel %vm1183_vm11, %v1185_v13, %v1181_v26 }
0x13d4   :  { %v1108_v52 = vpop.f32.mrf.mxu0 }
0x13d5   :  { %v1132_v53 = vadd.f32 %v1108_v52, %v1703_v50  ;;  %v1112_v27 = vadd.f32 %v1108_v52, %v1089_v4 }
0x13d7   :  { %1134 = vrot.lane.b32.xlu0 %v1132_v53, %s1579_s29  ;;  %v1447_v8 = vmul.f32 -1.442695, %v1112_v27 }
0x13d9   :  { %1565 = vpow2.f32 %v1447_v8  ;;  %v1479_v8 = vld [vmem:[%s1970_s2 + $0x48] sm:$0xff] }
0x13da   :  { %1336 = vmatpush.bf16.msra.mxu0 %v1479_v8 }
0x13dc   :  { %v1110_v54 = vpop.f32.mrf.mxu0 }
0x13df   :  { %v1566_v10 = vpop.eup %1565 }
0x13e0   :  { %v1116_v11 = vadd.f32 1.0, %v1566_v10  ;;  %v1478_v10 = vld [vmem:[%s1970_s2 + $0x40] sm:$0xff] }
0x13e1   :  { %1337 = vmatpush.bf16.msra.mxu0 %v1478_v10 }
0x13e2   :  { %1567 = vrcp.f32 %v1116_v11  ;;  %v1128_v60 = vand.u32 2147483648, %v1116_v11  ;;  %vm1122_vm13 = vweird.f32 %v1116_v11  ;;  %v1126_v18 = vand.u32 2147483647, %v1116_v11 }
0x13e4   :  { %v1129_v21 = vor.u32 1.1754944e-38, %v1128_v60  ;;  %vm1127_vm15 = vcmp.eq.f32.partialorder %v1126_v18, 8.507059e+37  ;;  %v20_v60 = vld [vmem:[%s1972_s3 + $0x4] sm:$0x3] }
0x13e5   :  { %v1311_v18 = vperm.slane %v20_v60, 0 }
0x13e8   :  { %v1568_v12 = vpop.eup %1567 }
0x13e9   :  { %v1118_v14 = vmul.f32 %v1568_v12, %v1116_v11  ;;  %vm1123_vm12 = vweird.f32 %v1568_v12 }
0x13ea   :  { %vm1124_vm14 = vmor %vm1122_vm13, %vm1123_vm12 }
0x13eb   :  { %v1119_v15 = vsub.f32 1.0, %v1118_v14 }
0x13ed   :  { %v1120_v58 = vmul.f32 %v1568_v12, %v1119_v15 }
0x13ef   :  { %v1121_v16 = vadd.f32 %v1568_v12, %v1120_v58 }
0x13f1   :  { %v1125_v19 = vsel %vm1124_vm14, %v1568_v12, %v1121_v16 }
0x13f2   :  { %v1130_v23 = vsel %vm1127_vm15, %v1129_v21, %v1125_v19 }
0x1419   :  { %v1191_v6 = vpop.permute.xlu1 %1190 }
0x141a   :  { %v1193_v7 = vmul.f32 %v1191_v6, %v1186_v5 }
0x141c   :  { %1195 = vrot.lane.b32.xlu0 %v1193_v7, %s1579_s29 }
0x1449   :  { %v1135_v22 = vpop.permute.xlu0 %1134 }
0x144a   :  { %v1137_v24 = vmul.f32 %v1135_v22, %v1130_v23 }
0x144c   :  { %1139 = vrot.lane.b32.xlu2 %v1137_v24, %s1579_s29 }
0x148e   :  { %v1196_v28 = vpop.permute.xlu0 %1195 }
0x148f   :  { %v1198_v29 = vadd.f32 %v1196_v28, %v106_v55 }
0x1491   :  { %1569 = vtanh.f32 %v1198_v29 }
0x1497   :  { %v1570_v30 = vpop.eup %1569 }
0x1498   :  { %v1200_v31 = vsub.f32 %v1907_v17, %v1570_v30 }
0x149a   :  { %1202 = vrot.lane.b32.xlu2 %v1200_v31, %s1581_s1 }
0x14a6   :  { %v1140_v32 = vpop.permute.xlu2 %1139 }
0x14a7   :  { %v1142_v33 = vadd.f32 %v1140_v32, %v1089_v4 }
0x14a9   :  { %1571 = vtanh.f32 %v1142_v33 }
0x14af   :  { %v1572_v34 = vpop.eup %1571 }
0x14b0   :  { %v1144_v35 = vsub.f32 %v1912_v20, %v1572_v34 }
0x14b2   :  { %1146 = vrot.lane.b32.xlu1 %v1144_v35, %s1581_s1 }
0x14f4   :  { %v1203_v36 = vpop.permute.xlu2 %1202 }
0x14f5   :  { %v1205_v37 = vmul.f32 %v1203_v36, %v1186_v5 }
0x14f7   :  { %1207 = vrot.lane.b32.xlu1 %v1205_v37, %s1580_s30 }
0x1524   :  { %v1147_v38 = vpop.permute.xlu1 %1146 }
0x1525   :  { %v1149_v40 = vmul.f32 %v1147_v38, %v1130_v23 }
0x1527   :  { %1151 = vrot.lane.b32.xlu0 %v1149_v40, %s1580_s30 }
0x1569   :  { %v1208_v44 = vpop.permute.xlu1 %1207 }
0x156a   :  { %v1210_v17 = vadd.f32 %v1570_v30, %v1208_v44 }
0x156c   :  { %v1211_v46 = vpack.c.bf16 %v1210_v17, %v1210_v17 }
0x156e   :  { %1213 = vrot.lane.b32.xlu0 %v1211_v46, %s1579_s29 }
0x1599   :  { %v1152_v47 = vpop.permute.xlu0 %1151 }
0x159a   :  { %v1154_v1 = vadd.f32 %v1572_v34, %v1152_v47 }
0x159c   :  { %v1231_v3 = vpack.c.bf16 %v1154_v1, %v1154_v1 }
0x159e   :  { %1233 = vrot.lane.b32.xlu2 %v1231_v3, %s1579_s29 }
0x15e0   :  { %v1214_v20 = vpop.permute.xlu0 %1213 }
0x15e1   :  { %1450 = vmatmul.msk.bf16.vlgmr.msra.gmra.mxu2 %vm66_vm0, %v1214_v20 }
0x15f8   :  { %v1234_v39 = vpop.permute.xlu2 %1233 }
0x15f9   :  { %1451 = vmatmul.msk.bf16.vlgmr.msra.gmra.mxu3 %vm66_vm0, %v1234_v39 }
0x1664   :  { %v1227_v42 = vpop.f32.mrf.mxu2 }
0x1665   :  { %v1228_v52 = vadd.f32 %v1227_v42, %v1714_v57 }
0x166c   :  { %v1229_v49 = vpop.f32.mrf.mxu2 }
0x167c   :  { %v1247_v51 = vpop.f32.mrf.mxu3 }
0x167d   :  { %v1271_v41 = vadd.f32 %v1247_v51, %v1703_v50  ;;  %v1251_v53 = vadd.f32 %v1247_v51, %v1228_v52 }
0x167f   :  { %1273 = vrot.lane.b32.xlu1 %v1271_v41, %s1579_s29  ;;  %v1452_v54 = vmul.f32 -1.442695, %v1251_v53 }
0x1681   :  { %1573 = vpow2.f32 %v1452_v54 }
0x1684   :  { %v1249_v45 = vpop.f32.mrf.mxu3 }
0x1687   :  { %v1574_v55 = vpop.eup %1573 }
0x1688   :  { %v1255_v56 = vadd.f32 1.0, %v1574_v55 }
0x168a   :  { %1575 = vrcp.f32 %v1255_v56  ;;  %v1267_v61 = vand.u32 2147483648, %v1255_v56  ;;  %vm1261_vm2 = vweird.f32 %v1255_v56  ;;  %v1265_v50 = vand.u32 2147483647, %v1255_v56 }
0x168c   :  { %v1268_v63 = vor.u32 1.1754944e-38, %v1267_v61  ;;  %vm1266_vm4 = vcmp.eq.f32.partialorder %v1265_v50, 8.507059e+37 }
0x1690   :  { %v1576_v48 = vpop.eup %1575 }
0x1691   :  { %v1257_v43 = vmul.f32 %v1576_v48, %v1255_v56  ;;  %vm1262_vm1 = vweird.f32 %v1576_v48 }
0x1692   :  { %vm1263_vm3 = vmor %vm1261_vm2, %vm1262_vm1 }
0x1693   :  { %v1258_v25 = vsub.f32 1.0, %v1257_v43 }
0x1695   :  { %v1259_v9 = vmul.f32 %v1576_v48, %v1258_v25 }
0x1697   :  { %v1260_v59 = vadd.f32 %v1576_v48, %v1259_v9 }
0x1699   :  { %v1264_v62 = vsel %vm1263_vm3, %v1576_v48, %v1260_v59 }
0x169a   :  { %v1269_v0 = vsel %vm1266_vm4, %v1268_v63, %v1264_v62 }
0x16f1   :  { %v1274_v57 = vpop.permute.xlu1 %1273 }
0x16f2   :  { %v1276_v2 = vmul.f32 %v1274_v57, %v1269_v0 }
0x16f4   :  { %1278 = vrot.lane.b32.xlu2 %v1276_v2, %s1579_s29 }
0x174e   :  { %v1279_v4 = vpop.permute.xlu2 %1278 }
0x174f   :  { %v1281_v26 = vadd.f32 %v1279_v4, %v1228_v52 }
0x1751   :  { %1577 = vtanh.f32 %v1281_v26 }
0x1757   :  { %v1578_v13 = vpop.eup %1577 }
0x1758   :  { %v1283_v27 = vsub.f32 %v1154_v1, %v1578_v13 }
0x175a   :  { %1285 = vrot.lane.b32.xlu0 %v1283_v27, %s1581_s1 }
0x1762   :  { %1295 = vrot.lane.b32.xlu0 %v1210_v17, %s1579_s29 }
0x17cc   :  { %v1286_v5 = vpop.permute.xlu0 %1285 }
0x17cd   :  { %v1288_v6 = vmul.f32 %v1286_v5, %v1269_v0 }
0x17cf   :  { %1290 = vrot.lane.b32.xlu1 %v1288_v6, %s1580_s30 }
0x17d4   :  { %v1296_v7 = vpop.permute.xlu0 %1295 }
0x17d5   :  { %1298 = vst.msk [vmem:[%s1974_s4] sm:$0xff] %vm66_vm0, %v1296_v7 }
0x1841   :  { %v1291_v11 = vpop.permute.xlu1 %1290 }
0x1842   :  { %v1293_v12 = vadd.f32 %v1578_v13, %v1291_v11 }
0x1844   :  { %v1304_v14 = vmax.f32 %v1293_v12, 0.0  ;;  %1300 = vrot.lane.b32.xlu1 %v1293_v12, %s1579_s29 }
0x1846   :  { %v1305_v15 = vpack.c.bf16 %v1304_v14, %v1304_v14 }
0x1848   :  { %1313 = vrot.lane.b32.xlu2 %v1305_v15, %s1579_s29 }
0x18a2   :  { %v1314_v58 = vpop.permute.xlu2 %1313 }
0x18a3   :  { %1465 = vmatmul.msk.bf16.vlgmr.msra.gmra.mxu0 %vm66_vm0, %v1314_v58 }
0x18b6   :  { %v1301_v16 = vpop.permute.xlu1 %1300 }
0x18b7   :  { %1303 = vst.msk [vmem:[%s1974_s4 + $0x8] sm:$0xff] %vm66_vm0, %v1301_v16 }
0x1920   :  { %v1339_v19 = vpop.f32.mrf.mxu0 }
0x1921   :  { %v1340_v21 = vadd.f32 %v1339_v19, %v1311_v18 }
0x1923   :  { %1343 = vst.msk [vmem:[%s1974_s4 + $0x10] sm:$0xff] %vm66_vm0, %v1340_v21 }
0x1928   :  { %v1341_v22 = vpop.f32.mrf.mxu0 }

</bundles_post_ra>
